<compile_context>
chip_gen: v7x
topology: tpu7x:2x2x1
jax: 0.10.0
libtpu: 0.0.40
codegen_flags: <defaults>
</compile_context>

<pallas_src>
import functools
import math

import jax
import jax.numpy as jnp
from jax import lax
from jax.experimental import pallas as pl
from jax.experimental.pallas import tpu as pltpu


# ----------------------------------------------------------------------------
# Transformer-XL _rel_shift on a single (S, S) tile
#   result[i, j] = bd[i, S-1+j-i]   for j <= i
#                = 0                for j == i+1
#                = bd[i+1, j-i-2]   for j >= i+2
# ----------------------------------------------------------------------------
def _rel_shift_strided(bd, S, row, col):
    # skew[i, j] = bd[i, (j - i - 1) mod S]  (per-row lane roll, amount 1 + i)
    skew = pltpu.roll(bd, shift=1, axis=1, stride=1, stride_axis=0)
    # skew_up[i, :] = skew[(i + 1) mod S, :]  (static sublane roll; wrapped row masked)
    skew_up = pltpu.roll(skew, shift=S - 1, axis=0)
    return (jnp.where(col <= row, skew, 0.0)
            + jnp.where(col >= row + 2, skew_up, 0.0))


def _rel_shift_fallback(bd, S, row, col):
    # Roll-free version (only used if the strided roll fails to lower on the
    # local Mosaic build).  O(S) selects over (S,S) masks -> small S only.
    assert S <= 128, "select-based rel_shift fallback is only intended for small S"
    shup = jnp.where(col == row + 1, 1.0, 0.0).astype(jnp.float32)    # eye(S, k=1)
    bd_up = jnp.dot(shup, bd, preferred_element_type=jnp.float32)     # bd_up[i] = bd[i+1]
    low_src = (S - 1) - (row - col)     # source column for j <= i
    high_src = col - row - 2            # source column (in bd_up) for j >= i+2
    out = jnp.zeros_like(bd)
    for q in range(S):
        bcol = bd[:, q:q + 1]           # (S, 1) lane-broadcasts inside where()
        bcolu = bd_up[:, q:q + 1]
        out = jnp.where((col <= row) & (low_src == q), bcol, out)
        out = jnp.where((col >= row + 2) & (high_src == q), bcolu, out)
    return out


# ----------------------------------------------------------------------------
# Pallas kernel: one (batch, head) grid step
# ----------------------------------------------------------------------------
def _rel_mha_kernel(
    x_ref,      # (S, H)   input rows for this batch element (f32)
    wqkv_ref,   # (H, 3D)  fused q|k|v projection for this head
    rkT_ref,    # (D, S)   precomputed r_net(pos) for this head, transposed
    wo_ref,     # (D, H)   this head's o_net block
    rwb_ref,    # (1, D)   r_w_bias for this head (f32)
    rrb_ref,    # (1, D)   r_r_bias for this head (f32)
    lnw_ref,    # (1, H)   layer_norm.weight (f32)
    lnb_ref,    # (1, H)   layer_norm.bias (f32)
    out_ref,    # (S, H)   f32 output block == per-head accumulator (resident over heads)
    *, S, D, scale, eps, compute_dtype, use_strided_roll, approx_recip,
):
    f32 = jnp.float32
    n = pl.program_id(1)
    cdt = compute_dtype

    x = x_ref[...]                       # (S, H) f32 (residual uses this exactly)
    xc = x.astype(cdt)                   # MXU operand dtype (bf16 in perf mode)

    # Fused per-head projection (one MXU matmul), then split q / k / v.
    qkv = jnp.dot(xc, wqkv_ref[...], preferred_element_type=f32)     # (S, 3D)
    q = qkv[:, :D]
    k = qkv[:, D:2 * D]
    v = qkv[:, 2 * D:3 * D]

    # Fold the attention scale into the (S, D) biased queries (cheaper than
    # scaling the (S, S) score tile; mathematically identical).
    rw_q = ((q + rwb_ref[...]) * scale).astype(cdt)
    rr_q = ((q + rrb_ref[...]) * scale).astype(cdt)

    # AC: (q + r_w_bias) @ k^T ;  BD: (q + r_r_bias) @ rk^T   (both (S, S), f32 acc)
    ac = lax.dot_general(rw_q, k.astype(cdt), (((1,), (1,)), ((), ())),
                         preferred_element_type=f32)
    bd = jnp.dot(rr_q, rkT_ref[...], preferred_element_type=f32)

    row = lax.broadcasted_iota(jnp.int32, (S, S), 0)
    col = lax.broadcasted_iota(jnp.int32, (S, S), 1)
    if use_strided_roll:
        bd_shift = _rel_shift_strided(bd, S, row, col)
    else:
        bd_shift = _rel_shift_fallback(bd, S, row, col)

    # softmax over the key axis (f32); normalization deferred past p@v.
    score = ac + bd_shift
    score = score - jnp.max(score, axis=-1, keepdims=True)
    p = jnp.exp(score)                                   # (S, S) unnormalized
    denom = jnp.sum(p, axis=-1, keepdims=True)           # (S, 1)

    vec = jnp.dot(p.astype(cdt), v.astype(cdt), preferred_element_type=f32)   # (S, D)
    if approx_recip:
        vec = vec * pl.reciprocal(denom, approx=True)    # EUP slot instead of VALU divide
    else:
        vec = vec / denom

    # per-head o_net partial, accumulated directly into the resident output block
    partial = jnp.dot(vec.astype(cdt), wo_ref[...], preferred_element_type=f32)  # (S, H)

    @pl.when(n == 0)
    def _first():
        out_ref[...] = partial

    @pl.when(n > 0)
    def _accumulate():
        out_ref[...] = out_ref[...] + partial

    @pl.when(n == pl.num_programs(1) - 1)
    def _finalize():
        # residual + post-LayerNorm (pre_lnorm=False path), all f32
        y = x + out_ref[...]
        mu = jnp.mean(y, axis=-1, keepdims=True)
        var = jnp.mean((y - mu) ** 2, axis=-1, keepdims=True)
        y = (y - mu) * lax.rsqrt(var + eps)
        out_ref[...] = (y * lnw_ref[...] + lnb_ref[...]).astype(out_ref.dtype)


# ----------------------------------------------------------------------------
# Wrapper: weight re-layout + pallas_call with a (B, N) grid
# ----------------------------------------------------------------------------
def rel_mha_forward(x_sbh, pos_rh, qkv_w, r_w, o_w, r_w_bias, r_r_bias, ln_w, ln_b,
                    *, use_bf16=True, use_strided_roll=True):
    """Forward of RelPartialLearnableMultiHeadAttn (no memory, no mask, eval)."""
    S, B, H = x_sbh.shape
    R = pos_rh.shape[0]
    assert R == S, "rlen must equal klen (no-memory case)"
    N, D = r_w_bias.shape

    cdt = jnp.bfloat16 if use_bf16 else jnp.float32
    hp = lax.Precision.HIGHEST

    # layout: (seq, batch, hidden) -> (batch, seq, hidden); keep x in f32 so the
    # residual inside the kernel is exact (cast to bf16 only at matmul sites).
    x_bsh = jnp.transpose(x_sbh, (1, 0, 2)).astype(jnp.float32)          # (B, S, H)

    # Fused per-head q|k|v projection blocks: wqkv[n, h, p*D + d] = qkv_w[p,n,d,h]
    w3 = qkv_w.reshape(3, N, D, H)
    wqkv = jnp.transpose(w3, (1, 3, 0, 2)).reshape(N, H, 3 * D).astype(cdt)   # (N, H, 3D)

    # r_net applied once (batch-independent), per-head and pre-transposed so the
    # bd matmul is a plain (S,D)@(D,S) dot inside the kernel.
    r_head_k = jnp.einsum('rh,oh->ro', pos_rh.astype(jnp.float32),
                          r_w.astype(jnp.float32), precision=hp)             # (S, N*D)
    rkT = jnp.transpose(r_head_k.reshape(S, N, D), (1, 2, 0)).astype(cdt)     # (N, D, S)

    wo = jnp.transpose(o_w.reshape(H, N, D), (1, 2, 0)).astype(cdt)           # (N, D, H)

    rwb = r_w_bias.reshape(N, 1, D).astype(jnp.float32)
    rrb = r_r_bias.reshape(N, 1, D).astype(jnp.float32)
    lnw = ln_w.reshape(1, H).astype(jnp.float32)
    lnb = ln_b.reshape(1, H).astype(jnp.float32)

    kernel = functools.partial(
        _rel_mha_kernel,
        S=S, D=D, scale=1.0 / math.sqrt(D), eps=1e-5,
        compute_dtype=cdt,
        use_strided_roll=use_strided_roll,
        approx_recip=use_bf16,
    )

    wbytes = 2 if use_bf16 else 4
    flops_step = 2 * S * H * 3 * D + 3 * (2 * S * S * D) + 2 * S * D * H
    cost = pl.CostEstimate(
        flops=B * N * flops_step,
        transcendentals=B * N * S * S,
        bytes_accessed=(2 * B * S * H * 4                       # x in + out
                        + N * (H * 3 * D + D * S + D * H) * wbytes
                        + N * 2 * D * 4 + 2 * H * 4),
    )

    out_bsh = pl.pallas_call(
        kernel,
        grid=(B, N),
        in_specs=[
            pl.BlockSpec((None, S, H), lambda b, n: (b, 0, 0)),        # x (resident over heads)
            pl.BlockSpec((None, H, 3 * D), lambda b, n: (n, 0, 0)),    # fused wq|wk|wv
            pl.BlockSpec((None, D, S), lambda b, n: (n, 0, 0)),        # rk^T (precomputed)
            pl.BlockSpec((None, D, H), lambda b, n: (n, 0, 0)),        # wo
            pl.BlockSpec((None, 1, D), lambda b, n: (n, 0, 0)),        # r_w_bias
            pl.BlockSpec((None, 1, D), lambda b, n: (n, 0, 0)),        # r_r_bias
            pl.BlockSpec((1, H), lambda b, n: (0, 0)),                 # ln weight
            pl.BlockSpec((1, H), lambda b, n: (0, 0)),                 # ln bias
        ],
        out_specs=pl.BlockSpec((None, S, H), lambda b, n: (b, 0, 0)),
        out_shape=jax.ShapeDtypeStruct((B, S, H), jnp.float32),
        compiler_params=pltpu.CompilerParams(
            dimension_semantics=("parallel", "arbitrary"),
            # <= ~48 MiB keeps headroom on v7x's 64 MiB physical VMEM while
            # raising the default scoped limit on v5e/v6e.
            vmem_limit_bytes=48 * 1024 * 1024,
        ),
        cost_estimate=cost,
    )(x_bsh, wqkv, rkT, wo, rwb, rrb, lnw, lnb)

    return jnp.transpose(out_bsh, (1, 0, 2))   # back to (seq, batch, hidden)


# ----------------------------------------------------------------------------
# Pure-JAX reference (mirrors the PyTorch forward exactly; eval dropout)
# ----------------------------------------------------------------------------
def reference_forward(x, pos, qkv_w, r_w, o_w, rwb, rrb, ln_w, ln_b, scale, eps=1e-5):
    S, B, H = x.shape
    R = pos.shape[0]
    N, D = rwb.shape
    hp = jax.lax.Precision.HIGHEST
    w_heads = jnp.einsum('sbh,oh->sbo', x, qkv_w, precision=hp)
    r_head_k = jnp.einsum('rh,oh->ro', pos, r_w, precision=hp)
    q, k, v = jnp.split(w_heads, 3, axis=-1)
    q = q.reshape(S, B, N, D)
    k = k.reshape(S, B, N, D)
    v = v.reshape(S, B, N, D)
    rk = r_head_k.reshape(R, N, D)
    ac = jnp.einsum('ibnd,jbnd->ijbn', q + rwb, k, precision=hp)
    bd = jnp.einsum('ibnd,jnd->ijbn', q + rrb, rk, precision=hp)
    # _rel_shift
    zero_pad = jnp.zeros((S, 1, B, N), bd.dtype)
    xp = jnp.concatenate([zero_pad, bd], axis=1).reshape(R + 1, S, B, N)
    bd = xp[1:].reshape(S, R, B, N)
    score = (ac + bd) * scale
    prob = jax.nn.softmax(score, axis=1)
    vec = jnp.einsum('ijbn,jbnd->ibnd', prob, v, precision=hp).reshape(S, B, N * D)
    out = x + jnp.einsum('sbo,ho->sbh', vec, o_w, precision=hp)
    mu = out.mean(-1, keepdims=True)
    var = ((out - mu) ** 2).mean(-1, keepdims=True)
    return (out - mu) / jnp.sqrt(var + eps) * ln_w + ln_b


# ----------------------------------------------------------------------------
# Main
# ----------------------------------------------------------------------------
if __name__ == "__main__":
    S, B, H, N, D = 8, 2, 32, 2, 16   # seq, batch, hidden, heads, head_dim

    key = jax.random.PRNGKey(0)
    ks = jax.random.split(key, 8)
    x = jax.random.normal(ks[0], (S, B, H), jnp.float32)       # (seq, batch, hidden)
    pos = jax.random.normal(ks[1], (S, H), jnp.float32)        # (rlen, hidden)
    qkv_w = 0.05 * jax.random.normal(ks[2], (3 * N * D, H), jnp.float32)  # qkv_net.weight
    r_w = 0.05 * jax.random.normal(ks[3], (N * D, H), jnp.float32)        # r_net.weight
    o_w = 0.05 * jax.random.normal(ks[4], (H, N * D), jnp.float32)        # o_net.weight
    r_w_bias = 0.05 * jax.random.normal(ks[5], (N, D), jnp.float32)
    r_r_bias = 0.05 * jax.random.normal(ks[6], (N, D), jnp.float32)
    ln_w = 1.0 + 0.02 * jax.random.normal(ks[7], (H,), jnp.float32)       # normal(1.0, 0.02)
    ln_b = jnp.zeros((H,), jnp.float32)

    args = (x, pos, qkv_w, r_w, o_w, r_w_bias, r_r_bias, ln_w, ln_b)

    # Performance config: bf16 MXU operands + approx EUP reciprocal + strided
    # XLU roll rel-shift.  Fall back to the select-based rel-shift if the
    # strided roll is unsupported by the local Mosaic build.
    roll_ok = True
    try:
        out_fast = jax.block_until_ready(
            rel_mha_forward(*args, use_bf16=True, use_strided_roll=True))
    except Exception:
        roll_ok = False
        out_fast = jax.block_until_ready(
            rel_mha_forward(*args, use_bf16=True, use_strided_roll=False))

    # Strict-precision config (f32 operands, exact divide) for validation.
    out_f32 = jax.block_until_ready(
        rel_mha_forward(*args, use_bf16=False, use_strided_roll=roll_ok))

    ref = reference_forward(x, pos, qkv_w, r_w, o_w, r_w_bias, r_r_bias,
                            ln_w, ln_b, scale=1.0 / math.sqrt(D))

    assert out_f32.shape == (S, B, H) and out_fast.shape == (S, B, H)
    if not jnp.allclose(out_f32, ref, atol=2e-3, rtol=2e-3):
        max_err = float(jnp.max(jnp.abs(out_f32 - ref)))
        raise AssertionError(f"f32 kernel mismatch vs reference, max abs err = {max_err}")
    if not jnp.allclose(out_fast, ref, atol=5e-2, rtol=5e-2):
        max_err = float(jnp.max(jnp.abs(out_fast - ref)))
        raise AssertionError(f"bf16 kernel mismatch vs reference, max abs err = {max_err}")

    print("KERNEL_OK")
</pallas_src>

<mosaic_0001>
module attributes {stable_mosaic.version = 11 : i64} {
  func.func @_rel_mha_kernel(%arg0: i32, %arg1: i32, %arg2: memref<1x8x32xf32, #tpu.memory_space<vmem>>, %arg3: memref<1x32x48xbf16, #tpu.memory_space<vmem>>, %arg4: memref<1x16x8xbf16, #tpu.memory_space<vmem>>, %arg5: memref<1x16x32xbf16, #tpu.memory_space<vmem>>, %arg6: memref<1x1x16xf32, #tpu.memory_space<vmem>>, %arg7: memref<1x1x16xf32, #tpu.memory_space<vmem>>, %arg8: memref<1x32xf32, #tpu.memory_space<vmem>>, %arg9: memref<1x32xf32, #tpu.memory_space<vmem>>, %arg10: memref<1x8x32xf32, #tpu.memory_space<vmem>>) attributes {dimension_semantics = [#tpu.dimension_semantics<parallel>, #tpu.dimension_semantics<arbitrary>], iteration_bounds = array<i64: 2, 2>, scalar_prefetch = 0 : i64, scratch_operands = 0 : i64, tpu.core_type = #tpu.core_type<tc>, window_params = [{transform_indices = @transform_0, window_bounds = array<i64: 1, 8, 32>}, {transform_indices = @transform_1, window_bounds = array<i64: 1, 32, 48>}, {transform_indices = @transform_2, window_bounds = array<i64: 1, 16, 8>}, {transform_indices = @transform_3, window_bounds = array<i64: 1, 16, 32>}, {transform_indices = @transform_4, window_bounds = array<i64: 1, 1, 16>}, {transform_indices = @transform_5, window_bounds = array<i64: 1, 1, 16>}, {pipeline_mode = #tpu.pipeline_mode<synchronous>, transform_indices = @transform_6, window_bounds = array<i64: 1, 32>}, {pipeline_mode = #tpu.pipeline_mode<synchronous>, transform_indices = @transform_7, window_bounds = array<i64: 1, 32>}, {transform_indices = @transform_8, window_bounds = array<i64: 1, 8, 32>}]} {
    %c0 = arith.constant 0 : index
    %c0_0 = arith.constant 0 : index
    %c0_1 = arith.constant 0 : index
    %0 = vector.load %arg2[%c0, %c0_0, %c0_1] : memref<1x8x32xf32, #tpu.memory_space<vmem>>, vector<1x8x32xf32>
    %1 = vector.shape_cast %0 : vector<1x8x32xf32> to vector<8x32xf32>
    %2 = arith.truncf %1 : vector<8x32xf32> to vector<8x32xbf16>
    %c0_2 = arith.constant 0 : index
    %c0_3 = arith.constant 0 : index
    %c0_4 = arith.constant 0 : index
    %3 = vector.load %arg3[%c0_2, %c0_3, %c0_4] : memref<1x32x48xbf16, #tpu.memory_space<vmem>>, vector<1x32x48xbf16>
    %4 = vector.shape_cast %3 : vector<1x32x48xbf16> to vector<32x48xbf16>
    %cst = arith.constant dense<0.000000e+00> : vector<8x48xf32>
    %5 = tpu.matmul %2, %4, %cst {dimension_numbers = #tpu.dot_dimension_numbers<[1], [0], [0], [1], [0, 0, 1, 1], [], []>} : vector<8x32xbf16>, vector<32x48xbf16>, vector<8x48xf32> -> vector<8x48xf32>
    %6 = vector.extract_strided_slice %5 {offsets = [0, 0], sizes = [8, 16], strides = [1, 1]} : vector<8x48xf32> to vector<8x16xf32>
    %7 = vector.extract_strided_slice %5 {offsets = [0, 16], sizes = [8, 16], strides = [1, 1]} : vector<8x48xf32> to vector<8x16xf32>
    %8 = vector.extract_strided_slice %5 {offsets = [0, 32], sizes = [8, 16], strides = [1, 1]} : vector<8x48xf32> to vector<8x16xf32>
    %c0_5 = arith.constant 0 : index
    %c0_6 = arith.constant 0 : index
    %c0_7 = arith.constant 0 : index
    %9 = vector.load %arg6[%c0_5, %c0_6, %c0_7] : memref<1x1x16xf32, #tpu.memory_space<vmem>>, vector<1x1x16xf32>
    %10 = vector.shape_cast %9 : vector<1x1x16xf32> to vector<1x16xf32>
    %11 = vector.broadcast %10 : vector<1x16xf32> to vector<8x16xf32>
    %12 = arith.addf %6, %11 : vector<8x16xf32>
    %cst_8 = arith.constant 2.500000e-01 : f32
    %13 = vector.broadcast %cst_8 : f32 to vector<8x16xf32>
    %14 = arith.mulf %12, %13 : vector<8x16xf32>
    %15 = arith.truncf %14 : vector<8x16xf32> to vector<8x16xbf16>
    %c0_9 = arith.constant 0 : index
    %c0_10 = arith.constant 0 : index
    %c0_11 = arith.constant 0 : index
    %16 = vector.load %arg7[%c0_9, %c0_10, %c0_11] : memref<1x1x16xf32, #tpu.memory_space<vmem>>, vector<1x1x16xf32>
    %17 = vector.shape_cast %16 : vector<1x1x16xf32> to vector<1x16xf32>
    %18 = vector.broadcast %17 : vector<1x16xf32> to vector<8x16xf32>
    %19 = arith.addf %6, %18 : vector<8x16xf32>
    %cst_12 = arith.constant 2.500000e-01 : f32
    %20 = vector.broadcast %cst_12 : f32 to vector<8x16xf32>
    %21 = arith.mulf %19, %20 : vector<8x16xf32>
    %22 = arith.truncf %21 : vector<8x16xf32> to vector<8x16xbf16>
    %23 = arith.truncf %7 : vector<8x16xf32> to vector<8x16xbf16>
    %cst_13 = arith.constant dense<0.000000e+00> : vector<8x8xf32>
    %24 = tpu.matmul %15, %23, %cst_13 {dimension_numbers = #tpu.dot_dimension_numbers<[1], [1], [0], [0], [0, 0, 1, 0], [], []>} : vector<8x16xbf16>, vector<8x16xbf16>, vector<8x8xf32> -> vector<8x8xf32>
    %c0_14 = arith.constant 0 : index
    %c0_15 = arith.constant 0 : index
    %c0_16 = arith.constant 0 : index
    %25 = vector.load %arg4[%c0_14, %c0_15, %c0_16] : memref<1x16x8xbf16, #tpu.memory_space<vmem>>, vector<1x16x8xbf16>
    %26 = vector.shape_cast %25 : vector<1x16x8xbf16> to vector<16x8xbf16>
    %cst_17 = arith.constant dense<0.000000e+00> : vector<8x8xf32>
    %27 = tpu.matmul %22, %26, %cst_17 {dimension_numbers = #tpu.dot_dimension_numbers<[1], [0], [0], [1], [0, 0, 1, 1], [], []>} : vector<8x16xbf16>, vector<16x8xbf16>, vector<8x8xf32> -> vector<8x8xf32>
    %28 = tpu.iota {dimensions = array<i32: 0>} : vector<8x8xi32>
    %29 = tpu.iota {dimensions = array<i32: 1>} : vector<8x8xi32>
    %c1_i32 = arith.constant 1 : i32
    %30 = tpu.dynamic_rotate %27 by %c1_i32 dim 1 {stride = 1 : si32, stride_dimension = 0 : si32} : vector<8x8xf32>, i32 -> vector<8x8xf32>
    %c7_i32 = arith.constant 7 : i32
    %31 = tpu.dynamic_rotate %30 by %c7_i32 dim 0 : vector<8x8xf32>, i32 -> vector<8x8xf32>
    %32 = arith.cmpi sle, %29, %28 : vector<8x8xi32>
    %cst_18 = arith.constant 0.000000e+00 : f32
    %33 = vector.broadcast %cst_18 : f32 to vector<8x8xf32>
    %34 = arith.select %32, %30, %33 : vector<8x8xi1>, vector<8x8xf32>
    %c2_i32 = arith.constant 2 : i32
    %35 = vector.broadcast %c2_i32 : i32 to vector<8x8xi32>
    %36 = arith.addi %28, %35 : vector<8x8xi32>
    %37 = arith.cmpi sge, %29, %36 : vector<8x8xi32>
    %cst_19 = arith.constant 0.000000e+00 : f32
    %38 = vector.broadcast %cst_19 : f32 to vector<8x8xf32>
    %39 = arith.select %37, %31, %38 : vector<8x8xi1>, vector<8x8xf32>
    %40 = arith.addf %34, %39 : vector<8x8xf32>
    %41 = arith.addf %24, %40 : vector<8x8xf32>
    %cst_20 = arith.constant dense<0xFF800000> : vector<8xf32>
    %42 = vector.multi_reduction <maximumf>, %41, %cst_20 [1] : vector<8x8xf32> to vector<8xf32>
    %43 = vector.shape_cast %42 : vector<8xf32> to vector<8x1xf32>
    %44 = vector.broadcast %43 : vector<8x1xf32> to vector<8x8xf32>
    %45 = arith.subf %41, %44 : vector<8x8xf32>
    %46 = math.exp %45 : vector<8x8xf32>
    %cst_21 = arith.constant dense<0.000000e+00> : vector<8xf32>
    %47 = vector.multi_reduction <add>, %46, %cst_21 [1] : vector<8x8xf32> to vector<8xf32>
    %48 = vector.shape_cast %47 : vector<8xf32> to vector<8x1xf32>
    %49 = arith.truncf %46 : vector<8x8xf32> to vector<8x8xbf16>
    %50 = arith.truncf %8 : vector<8x16xf32> to vector<8x16xbf16>
    %cst_22 = arith.constant dense<0.000000e+00> : vector<8x16xf32>
    %51 = tpu.matmul %49, %50, %cst_22 {dimension_numbers = #tpu.dot_dimension_numbers<[1], [0], [0], [1], [0, 0, 1, 1], [], []>} : vector<8x8xbf16>, vector<8x16xbf16>, vector<8x16xf32> -> vector<8x16xf32>
    %52 = tpu.reciprocal %48 {approx = true} : vector<8x1xf32> -> vector<8x1xf32>
    %53 = vector.broadcast %52 : vector<8x1xf32> to vector<8x16xf32>
    %54 = arith.mulf %51, %53 : vector<8x16xf32>
    %55 = arith.truncf %54 : vector<8x16xf32> to vector<8x16xbf16>
    %c0_23 = arith.constant 0 : index
    %c0_24 = arith.constant 0 : index
    %c0_25 = arith.constant 0 : index
    %56 = vector.load %arg5[%c0_23, %c0_24, %c0_25] : memref<1x16x32xbf16, #tpu.memory_space<vmem>>, vector<1x16x32xbf16>
    %57 = vector.shape_cast %56 : vector<1x16x32xbf16> to vector<16x32xbf16>
    %cst_26 = arith.constant dense<0.000000e+00> : vector<8x32xf32>
    %58 = tpu.matmul %55, %57, %cst_26 {dimension_numbers = #tpu.dot_dimension_numbers<[1], [0], [0], [1], [0, 0, 1, 1], [], []>} : vector<8x16xbf16>, vector<16x32xbf16>, vector<8x32xf32> -> vector<8x32xf32>
    %c0_i32 = arith.constant 0 : i32
    %59 = arith.cmpi eq, %arg1, %c0_i32 : i32
    %60 = arith.extui %59 : i1 to i32
    %c0_i32_27 = arith.constant 0 : i32
    %61 = arith.cmpi ne, %60, %c0_i32_27 : i32
    scf.if %61 {
      %c0_32 = arith.constant 0 : index
      %c0_33 = arith.constant 0 : index
      %c0_34 = arith.constant 0 : index
      %68 = vector.load %arg10[%c0_32, %c0_33, %c0_34] : memref<1x8x32xf32, #tpu.memory_space<vmem>>, vector<1x8x32xf32>
      %69 = vector.shape_cast %68 : vector<1x8x32xf32> to vector<8x32xf32>
      %70 = vector.shape_cast %58 : vector<8x32xf32> to vector<1x8x32xf32>
      tpu.vector_store %arg10[%c0_32, %c0_33, %c0_34], %70 {strides = array<i32>} : memref<1x8x32xf32, #tpu.memory_space<vmem>>, vector<1x8x32xf32>,
    } else {
    }
    %c0_i32_28 = arith.constant 0 : i32
    %62 = arith.cmpi sgt, %arg1, %c0_i32_28 : i32
    %63 = arith.extui %62 : i1 to i32
    %c0_i32_29 = arith.constant 0 : i32
    %64 = arith.cmpi ne, %63, %c0_i32_29 : i32
    scf.if %64 {
      %c0_32 = arith.constant 0 : index
      %c0_33 = arith.constant 0 : index
      %c0_34 = arith.constant 0 : index
      %68 = vector.load %arg10[%c0_32, %c0_33, %c0_34] : memref<1x8x32xf32, #tpu.memory_space<vmem>>, vector<1x8x32xf32>
      %69 = vector.shape_cast %68 : vector<1x8x32xf32> to vector<8x32xf32>
      %70 = arith.addf %69, %58 : vector<8x32xf32>
      %c0_35 = arith.constant 0 : index
      %c0_36 = arith.constant 0 : index
      %c0_37 = arith.constant 0 : index
      %71 = vector.load %arg10[%c0_35, %c0_36, %c0_37] : memref<1x8x32xf32, #tpu.memory_space<vmem>>, vector<1x8x32xf32>
      %72 = vector.shape_cast %71 : vector<1x8x32xf32> to vector<8x32xf32>
      %73 = vector.shape_cast %70 : vector<8x32xf32> to vector<1x8x32xf32>
      tpu.vector_store %arg10[%c0_35, %c0_36, %c0_37], %73 {strides = array<i32>} : memref<1x8x32xf32, #tpu.memory_space<vmem>>, vector<1x8x32xf32>,
    } else {
    }
    %c1_i32_30 = arith.constant 1 : i32
    %65 = arith.cmpi eq, %arg1, %c1_i32_30 : i32
    %66 = arith.extui %65 : i1 to i32
    %c0_i32_31 = arith.constant 0 : i32
    %67 = arith.cmpi ne, %66, %c0_i32_31 : i32
    scf.if %67 {
      %c0_32 = arith.constant 0 : index
      %c0_33 = arith.constant 0 : index
      %c0_34 = arith.constant 0 : index
      %68 = vector.load %arg10[%c0_32, %c0_33, %c0_34] : memref<1x8x32xf32, #tpu.memory_space<vmem>>, vector<1x8x32xf32>
      %69 = vector.shape_cast %68 : vector<1x8x32xf32> to vector<8x32xf32>
      %70 = arith.addf %1, %69 : vector<8x32xf32>
      %cst_35 = arith.constant dense<0.000000e+00> : vector<8xf32>
      %71 = vector.multi_reduction <add>, %70, %cst_35 [1] : vector<8x32xf32> to vector<8xf32>
      %72 = vector.shape_cast %71 : vector<8xf32> to vector<8x1xf32>
      %cst_36 = arith.constant 3.200000e+01 : f32
      %73 = vector.broadcast %cst_36 : f32 to vector<8x1xf32>
      %74 = arith.divf %72, %73 : vector<8x1xf32>
      %75 = vector.broadcast %74 : vector<8x1xf32> to vector<8x32xf32>
      %76 = arith.subf %70, %75 : vector<8x32xf32>
      %77 = arith.mulf %76, %76 : vector<8x32xf32>
      %cst_37 = arith.constant dense<0.000000e+00> : vector<8xf32>
      %78 = vector.multi_reduction <add>, %77, %cst_37 [1] : vector<8x32xf32> to vector<8xf32>
      %79 = vector.shape_cast %78 : vector<8xf32> to vector<8x1xf32>
      %cst_38 = arith.constant 3.200000e+01 : f32
      %80 = vector.broadcast %cst_38 : f32 to vector<8x1xf32>
      %81 = arith.divf %79, %80 : vector<8x1xf32>
      %82 = vector.broadcast %74 : vector<8x1xf32> to vector<8x32xf32>
      %83 = arith.subf %70, %82 : vector<8x32xf32>
      %cst_39 = arith.constant 9.99999974E-6 : f32
      %84 = vector.broadcast %cst_39 : f32 to vector<8x1xf32>
      %85 = arith.addf %81, %84 : vector<8x1xf32>
      %86 = math.rsqrt %85 : vector<8x1xf32>
      %87 = vector.broadcast %86 : vector<8x1xf32> to vector<8x32xf32>
      %88 = arith.mulf %83, %87 : vector<8x32xf32>
      %c0_40 = arith.constant 0 : index
      %c0_41 = arith.constant 0 : index
      %89 = vector.load %arg8[%c0_40, %c0_41] : memref<1x32xf32, #tpu.memory_space<vmem>>, vector<1x32xf32>
      %90 = vector.broadcast %89 : vector<1x32xf32> to vector<8x32xf32>
      %91 = arith.mulf %88, %90 : vector<8x32xf32>
      %c0_42 = arith.constant 0 : index
      %c0_43 = arith.constant 0 : index
      %92 = vector.load %arg9[%c0_42, %c0_43] : memref<1x32xf32, #tpu.memory_space<vmem>>, vector<1x32xf32>
      %93 = vector.broadcast %92 : vector<1x32xf32> to vector<8x32xf32>
      %94 = arith.addf %91, %93 : vector<8x32xf32>
      %c0_44 = arith.constant 0 : index
      %c0_45 = arith.constant 0 : index
      %c0_46 = arith.constant 0 : index
      %95 = vector.load %arg10[%c0_44, %c0_45, %c0_46] : memref<1x8x32xf32, #tpu.memory_space<vmem>>, vector<1x8x32xf32>
      %96 = vector.shape_cast %95 : vector<1x8x32xf32> to vector<8x32xf32>
      %97 = vector.shape_cast %94 : vector<8x32xf32> to vector<1x8x32xf32>
      tpu.vector_store %arg10[%c0_44, %c0_45, %c0_46], %97 {strides = array<i32>} : memref<1x8x32xf32, #tpu.memory_space<vmem>>, vector<1x8x32xf32>,
    } else {
    }
    return
  }
  func.func @transform_0(%arg0: i32, %arg1: i32) -> (i32, i32, i32) {
    %c0_i32 = arith.constant 0 : i32
    %c0_i32_0 = arith.constant 0 : i32
    %c0_i32_1 = arith.constant 0 : i32
    return %arg0, %c0_i32, %c0_i32_0 : i32, i32, i32
  }
  func.func @transform_1(%arg0: i32, %arg1: i32) -> (i32, i32, i32) {
    %c0_i32 = arith.constant 0 : i32
    %c0_i32_0 = arith.constant 0 : i32
    %c0_i32_1 = arith.constant 0 : i32
    return %arg1, %c0_i32, %c0_i32_0 : i32, i32, i32
  }
  func.func @transform_2(%arg0: i32, %arg1: i32) -> (i32, i32, i32) {
    %c0_i32 = arith.constant 0 : i32
    %c0_i32_0 = arith.constant 0 : i32
    %c0_i32_1 = arith.constant 0 : i32
    return %arg1, %c0_i32, %c0_i32_0 : i32, i32, i32
  }
  func.func @transform_3(%arg0: i32, %arg1: i32) -> (i32, i32, i32) {
    %c0_i32 = arith.constant 0 : i32
    %c0_i32_0 = arith.constant 0 : i32
    %c0_i32_1 = arith.constant 0 : i32
    return %arg1, %c0_i32, %c0_i32_0 : i32, i32, i32
  }
  func.func @transform_4(%arg0: i32, %arg1: i32) -> (i32, i32, i32) {
    %c0_i32 = arith.constant 0 : i32
    %c0_i32_0 = arith.constant 0 : i32
    %c0_i32_1 = arith.constant 0 : i32
    return %arg1, %c0_i32, %c0_i32_0 : i32, i32, i32
  }
  func.func @transform_5(%arg0: i32, %arg1: i32) -> (i32, i32, i32) {
    %c0_i32 = arith.constant 0 : i32
    %c0_i32_0 = arith.constant 0 : i32
    %c0_i32_1 = arith.constant 0 : i32
    return %arg1, %c0_i32, %c0_i32_0 : i32, i32, i32
  }
  func.func @transform_6(%arg0: i32, %arg1: i32) -> (i32, i32) {
    %c0_i32 = arith.constant 0 : i32
    %c0_i32_0 = arith.constant 0 : i32
    %c0_i32_1 = arith.constant 0 : i32
    return %c0_i32, %c0_i32_0 : i32, i32
  }
  func.func @transform_7(%arg0: i32, %arg1: i32) -> (i32, i32) {
    %c0_i32 = arith.constant 0 : i32
    %c0_i32_0 = arith.constant 0 : i32
    %c0_i32_1 = arith.constant 0 : i32
    return %c0_i32, %c0_i32_0 : i32, i32
  }
  func.func @transform_8(%arg0: i32, %arg1: i32) -> (i32, i32, i32) {
    %c0_i32 = arith.constant 0 : i32
    %c0_i32_0 = arith.constant 0 : i32
    %c0_i32_1 = arith.constant 0 : i32
    return %arg0, %c0_i32, %c0_i32_0 : i32, i32, i32
  }
}

module attributes {stable_mosaic.version = 11 : i64} {
  func.func @_rel_mha_kernel(%arg0: i32, %arg1: i32, %arg2: memref<1x8x32xf32, #tpu.memory_space<vmem>>, %arg3: memref<1x32x48xbf16, #tpu.memory_space<vmem>>, %arg4: memref<1x16x8xbf16, #tpu.memory_space<vmem>>, %arg5: memref<1x16x32xbf16, #tpu.memory_space<vmem>>, %arg6: memref<1x1x16xf32, #tpu.memory_space<vmem>>, %arg7: memref<1x1x16xf32, #tpu.memory_space<vmem>>, %arg8: memref<1x32xf32, #tpu.memory_space<vmem>>, %arg9: memref<1x32xf32, #tpu.memory_space<vmem>>, %arg10: memref<1x8x32xf32, #tpu.memory_space<vmem>>) attributes {dimension_semantics = [#tpu.dimension_semantics<parallel>, #tpu.dimension_semantics<arbitrary>], iteration_bounds = array<i64: 2, 2>, scalar_prefetch = 0 : i64, scratch_operands = 0 : i64, tpu.core_type = #tpu.core_type<tc>, window_params = [{transform_indices = @transform_0, window_bounds = array<i64: 1, 8, 32>}, {transform_indices = @transform_1, window_bounds = array<i64: 1, 32, 48>}, {transform_indices = @transform_2, window_bounds = array<i64: 1, 16, 8>}, {transform_indices = @transform_3, window_bounds = array<i64: 1, 16, 32>}, {transform_indices = @transform_4, window_bounds = array<i64: 1, 1, 16>}, {transform_indices = @transform_5, window_bounds = array<i64: 1, 1, 16>}, {pipeline_mode = #tpu.pipeline_mode<synchronous>, transform_indices = @transform_6, window_bounds = array<i64: 1, 32>}, {pipeline_mode = #tpu.pipeline_mode<synchronous>, transform_indices = @transform_7, window_bounds = array<i64: 1, 32>}, {transform_indices = @transform_8, window_bounds = array<i64: 1, 8, 32>}]} {
    %c0 = arith.constant 0 : index
    %c0_0 = arith.constant 0 : index
    %c0_1 = arith.constant 0 : index
    %0 = vector.load %arg2[%c0, %c0_0, %c0_1] : memref<1x8x32xf32, #tpu.memory_space<vmem>>, vector<1x8x32xf32>
    %1 = vector.shape_cast %0 : vector<1x8x32xf32> to vector<8x32xf32>
    %2 = arith.truncf %1 : vector<8x32xf32> to vector<8x32xbf16>
    %c0_2 = arith.constant 0 : index
    %c0_3 = arith.constant 0 : index
    %c0_4 = arith.constant 0 : index
    %3 = vector.load %arg3[%c0_2, %c0_3, %c0_4] : memref<1x32x48xbf16, #tpu.memory_space<vmem>>, vector<1x32x48xbf16>
    %4 = vector.shape_cast %3 : vector<1x32x48xbf16> to vector<32x48xbf16>
    %cst = arith.constant dense<0.000000e+00> : vector<8x48xf32>
    %5 = tpu.matmul %2, %4, %cst {dimension_numbers = #tpu.dot_dimension_numbers<[1], [0], [0], [1], [0, 0, 1, 1], [], []>} : vector<8x32xbf16>, vector<32x48xbf16>, vector<8x48xf32> -> vector<8x48xf32>
    %6 = vector.extract_strided_slice %5 {offsets = [0, 0], sizes = [8, 16], strides = [1, 1]} : vector<8x48xf32> to vector<8x16xf32>
    %7 = vector.extract_strided_slice %5 {offsets = [0, 16], sizes = [8, 16], strides = [1, 1]} : vector<8x48xf32> to vector<8x16xf32>
    %8 = vector.extract_strided_slice %5 {offsets = [0, 32], sizes = [8, 16], strides = [1, 1]} : vector<8x48xf32> to vector<8x16xf32>
    %c0_5 = arith.constant 0 : index
    %c0_6 = arith.constant 0 : index
    %c0_7 = arith.constant 0 : index
    %9 = vector.load %arg6[%c0_5, %c0_6, %c0_7] : memref<1x1x16xf32, #tpu.memory_space<vmem>>, vector<1x1x16xf32>
    %10 = vector.shape_cast %9 : vector<1x1x16xf32> to vector<1x16xf32>
    %11 = vector.broadcast %10 : vector<1x16xf32> to vector<8x16xf32>
    %12 = arith.addf %6, %11 : vector<8x16xf32>
    %cst_8 = arith.constant 2.500000e-01 : f32
    %13 = vector.broadcast %cst_8 : f32 to vector<8x16xf32>
    %14 = arith.mulf %12, %13 : vector<8x16xf32>
    %15 = arith.truncf %14 : vector<8x16xf32> to vector<8x16xbf16>
    %c0_9 = arith.constant 0 : index
    %c0_10 = arith.constant 0 : index
    %c0_11 = arith.constant 0 : index
    %16 = vector.load %arg7[%c0_9, %c0_10, %c0_11] : memref<1x1x16xf32, #tpu.memory_space<vmem>>, vector<1x1x16xf32>
    %17 = vector.shape_cast %16 : vector<1x1x16xf32> to vector<1x16xf32>
    %18 = vector.broadcast %17 : vector<1x16xf32> to vector<8x16xf32>
    %19 = arith.addf %6, %18 : vector<8x16xf32>
    %cst_12 = arith.constant 2.500000e-01 : f32
    %20 = vector.broadcast %cst_12 : f32 to vector<8x16xf32>
    %21 = arith.mulf %19, %20 : vector<8x16xf32>
    %22 = arith.truncf %21 : vector<8x16xf32> to vector<8x16xbf16>
    %23 = arith.truncf %7 : vector<8x16xf32> to vector<8x16xbf16>
    %cst_13 = arith.constant dense<0.000000e+00> : vector<8x8xf32>
    %24 = tpu.matmul %15, %23, %cst_13 {dimension_numbers = #tpu.dot_dimension_numbers<[1], [1], [0], [0], [0, 0, 1, 0], [], []>} : vector<8x16xbf16>, vector<8x16xbf16>, vector<8x8xf32> -> vector<8x8xf32>
    %c0_14 = arith.constant 0 : index
    %c0_15 = arith.constant 0 : index
    %c0_16 = arith.constant 0 : index
    %25 = vector.load %arg4[%c0_14, %c0_15, %c0_16] : memref<1x16x8xbf16, #tpu.memory_space<vmem>>, vector<1x16x8xbf16>
    %26 = vector.shape_cast %25 : vector<1x16x8xbf16> to vector<16x8xbf16>
    %cst_17 = arith.constant dense<0.000000e+00> : vector<8x8xf32>
    %27 = tpu.matmul %22, %26, %cst_17 {dimension_numbers = #tpu.dot_dimension_numbers<[1], [0], [0], [1], [0, 0, 1, 1], [], []>} : vector<8x16xbf16>, vector<16x8xbf16>, vector<8x8xf32> -> vector<8x8xf32>
    %28 = tpu.iota {dimensions = array<i32: 0>} : vector<8x8xi32>
    %29 = tpu.iota {dimensions = array<i32: 1>} : vector<8x8xi32>
    %c1_i32 = arith.constant 1 : i32
    %30 = vector.broadcast %c1_i32 : i32 to vector<8x8xi32>
    %31 = arith.addi %28, %30 : vector<8x8xi32>
    %32 = arith.cmpi eq, %29, %31 : vector<8x8xi32>
    %cst_18 = arith.constant 1.000000e+00 : f32
    %cst_19 = arith.constant 0.000000e+00 : f32
    %33 = vector.broadcast %cst_18 : f32 to vector<8x8xf32>
    %34 = vector.broadcast %cst_19 : f32 to vector<8x8xf32>
    %35 = arith.select %32, %33, %34 : vector<8x8xi1>, vector<8x8xf32>
    %cst_20 = arith.constant dense<0.000000e+00> : vector<8x8xf32>
    %36 = tpu.matmul %35, %27, %cst_20 {dimension_numbers = #tpu.dot_dimension_numbers<[1], [0], [0], [1], [0, 0, 1, 1], [], []>} : vector<8x8xf32>, vector<8x8xf32>, vector<8x8xf32> -> vector<8x8xf32>
    %37 = arith.subi %28, %29 : vector<8x8xi32>
    %c7_i32 = arith.constant 7 : i32
    %38 = vector.broadcast %c7_i32 : i32 to vector<8x8xi32>
    %39 = arith.subi %38, %37 : vector<8x8xi32>
    %40 = arith.subi %29, %28 : vector<8x8xi32>
    %c2_i32 = arith.constant 2 : i32
    %41 = vector.broadcast %c2_i32 : i32 to vector<8x8xi32>
    %42 = arith.subi %40, %41 : vector<8x8xi32>
    %cst_21 = arith.constant 0.000000e+00 : f32
    %43 = vector.broadcast %cst_21 : f32 to vector<8x8xf32>
    %44 = vector.extract_strided_slice %27 {offsets = [0, 0], sizes = [8, 1], strides = [1, 1]} : vector<8x8xf32> to vector<8x1xf32>
    %45 = vector.extract_strided_slice %36 {offsets = [0, 0], sizes = [8, 1], strides = [1, 1]} : vector<8x8xf32> to vector<8x1xf32>
    %46 = arith.cmpi sle, %29, %28 : vector<8x8xi32>
    %c0_i32 = arith.constant 0 : i32
    %47 = vector.broadcast %c0_i32 : i32 to vector<8x8xi32>
    %48 = arith.cmpi eq, %39, %47 : vector<8x8xi32>
    %49 = arith.andi %46, %48 : vector<8x8xi1>
    %50 = vector.shape_cast %44 : vector<8x1xf32> to vector<8x1xf32>
    %51 = vector.broadcast %50 : vector<8x1xf32> to vector<8x8xf32>
    %52 = arith.select %49, %51, %43 : vector<8x8xi1>, vector<8x8xf32>
    %c2_i32_22 = arith.constant 2 : i32
    %53 = vector.broadcast %c2_i32_22 : i32 to vector<8x8xi32>
    %54 = arith.addi %28, %53 : vector<8x8xi32>
    %55 = arith.cmpi sge, %29, %54 : vector<8x8xi32>
    %c0_i32_23 = arith.constant 0 : i32
    %56 = vector.broadcast %c0_i32_23 : i32 to vector<8x8xi32>
    %57 = arith.cmpi eq, %42, %56 : vector<8x8xi32>
    %58 = arith.andi %55, %57 : vector<8x8xi1>
    %59 = vector.shape_cast %45 : vector<8x1xf32> to vector<8x1xf32>
    %60 = vector.broadcast %59 : vector<8x1xf32> to vector<8x8xf32>
    %61 = arith.select %58, %60, %52 : vector<8x8xi1>, vector<8x8xf32>
    %62 = vector.extract_strided_slice %27 {offsets = [0, 1], sizes = [8, 1], strides = [1, 1]} : vector<8x8xf32> to vector<8x1xf32>
    %63 = vector.extract_strided_slice %36 {offsets = [0, 1], sizes = [8, 1], strides = [1, 1]} : vector<8x8xf32> to vector<8x1xf32>
    %64 = arith.cmpi sle, %29, %28 : vector<8x8xi32>
    %c1_i32_24 = arith.constant 1 : i32
    %65 = vector.broadcast %c1_i32_24 : i32 to vector<8x8xi32>
    %66 = arith.cmpi eq, %39, %65 : vector<8x8xi32>
    %67 = arith.andi %64, %66 : vector<8x8xi1>
    %68 = vector.shape_cast %62 : vector<8x1xf32> to vector<8x1xf32>
    %69 = vector.broadcast %68 : vector<8x1xf32> to vector<8x8xf32>
    %70 = arith.select %67, %69, %61 : vector<8x8xi1>, vector<8x8xf32>
    %c2_i32_25 = arith.constant 2 : i32
    %71 = vector.broadcast %c2_i32_25 : i32 to vector<8x8xi32>
    %72 = arith.addi %28, %71 : vector<8x8xi32>
    %73 = arith.cmpi sge, %29, %72 : vector<8x8xi32>
    %c1_i32_26 = arith.constant 1 : i32
    %74 = vector.broadcast %c1_i32_26 : i32 to vector<8x8xi32>
    %75 = arith.cmpi eq, %42, %74 : vector<8x8xi32>
    %76 = arith.andi %73, %75 : vector<8x8xi1>
    %77 = vector.shape_cast %63 : vector<8x1xf32> to vector<8x1xf32>
    %78 = vector.broadcast %77 : vector<8x1xf32> to vector<8x8xf32>
    %79 = arith.select %76, %78, %70 : vector<8x8xi1>, vector<8x8xf32>
    %80 = vector.extract_strided_slice %27 {offsets = [0, 2], sizes = [8, 1], strides = [1, 1]} : vector<8x8xf32> to vector<8x1xf32>
    %81 = vector.extract_strided_slice %36 {offsets = [0, 2], sizes = [8, 1], strides = [1, 1]} : vector<8x8xf32> to vector<8x1xf32>
    %82 = arith.cmpi sle, %29, %28 : vector<8x8xi32>
    %c2_i32_27 = arith.constant 2 : i32
    %83 = vector.broadcast %c2_i32_27 : i32 to vector<8x8xi32>
    %84 = arith.cmpi eq, %39, %83 : vector<8x8xi32>
    %85 = arith.andi %82, %84 : vector<8x8xi1>
    %86 = vector.shape_cast %80 : vector<8x1xf32> to vector<8x1xf32>
    %87 = vector.broadcast %86 : vector<8x1xf32> to vector<8x8xf32>
    %88 = arith.select %85, %87, %79 : vector<8x8xi1>, vector<8x8xf32>
    %c2_i32_28 = arith.constant 2 : i32
    %89 = vector.broadcast %c2_i32_28 : i32 to vector<8x8xi32>
    %90 = arith.addi %28, %89 : vector<8x8xi32>
    %91 = arith.cmpi sge, %29, %90 : vector<8x8xi32>
    %c2_i32_29 = arith.constant 2 : i32
    %92 = vector.broadcast %c2_i32_29 : i32 to vector<8x8xi32>
    %93 = arith.cmpi eq, %42, %92 : vector<8x8xi32>
    %94 = arith.andi %91, %93 : vector<8x8xi1>
    %95 = vector.shape_cast %81 : vector<8x1xf32> to vector<8x1xf32>
    %96 = vector.broadcast %95 : vector<8x1xf32> to vector<8x8xf32>
    %97 = arith.select %94, %96, %88 : vector<8x8xi1>, vector<8x8xf32>
    %98 = vector.extract_strided_slice %27 {offsets = [0, 3], sizes = [8, 1], strides = [1, 1]} : vector<8x8xf32> to vector<8x1xf32>
    %99 = vector.extract_strided_slice %36 {offsets = [0, 3], sizes = [8, 1], strides = [1, 1]} : vector<8x8xf32> to vector<8x1xf32>
    %100 = arith.cmpi sle, %29, %28 : vector<8x8xi32>
    %c3_i32 = arith.constant 3 : i32
    %101 = vector.broadcast %c3_i32 : i32 to vector<8x8xi32>
    %102 = arith.cmpi eq, %39, %101 : vector<8x8xi32>
    %103 = arith.andi %100, %102 : vector<8x8xi1>
    %104 = vector.shape_cast %98 : vector<8x1xf32> to vector<8x1xf32>
    %105 = vector.broadcast %104 : vector<8x1xf32> to vector<8x8xf32>
    %106 = arith.select %103, %105, %97 : vector<8x8xi1>, vector<8x8xf32>
    %c2_i32_30 = arith.constant 2 : i32
    %107 = vector.broadcast %c2_i32_30 : i32 to vector<8x8xi32>
    %108 = arith.addi %28, %107 : vector<8x8xi32>
    %109 = arith.cmpi sge, %29, %108 : vector<8x8xi32>
    %c3_i32_31 = arith.constant 3 : i32
    %110 = vector.broadcast %c3_i32_31 : i32 to vector<8x8xi32>
    %111 = arith.cmpi eq, %42, %110 : vector<8x8xi32>
    %112 = arith.andi %109, %111 : vector<8x8xi1>
    %113 = vector.shape_cast %99 : vector<8x1xf32> to vector<8x1xf32>
    %114 = vector.broadcast %113 : vector<8x1xf32> to vector<8x8xf32>
    %115 = arith.select %112, %114, %106 : vector<8x8xi1>, vector<8x8xf32>
    %116 = vector.extract_strided_slice %27 {offsets = [0, 4], sizes = [8, 1], strides = [1, 1]} : vector<8x8xf32> to vector<8x1xf32>
    %117 = vector.extract_strided_slice %36 {offsets = [0, 4], sizes = [8, 1], strides = [1, 1]} : vector<8x8xf32> to vector<8x1xf32>
    %118 = arith.cmpi sle, %29, %28 : vector<8x8xi32>
    %c4_i32 = arith.constant 4 : i32
    %119 = vector.broadcast %c4_i32 : i32 to vector<8x8xi32>
    %120 = arith.cmpi eq, %39, %119 : vector<8x8xi32>
    %121 = arith.andi %118, %120 : vector<8x8xi1>
    %122 = vector.shape_cast %116 : vector<8x1xf32> to vector<8x1xf32>
    %123 = vector.broadcast %122 : vector<8x1xf32> to vector<8x8xf32>
    %124 = arith.select %121, %123, %115 : vector<8x8xi1>, vector<8x8xf32>
    %c2_i32_32 = arith.constant 2 : i32
    %125 = vector.broadcast %c2_i32_32 : i32 to vector<8x8xi32>
    %126 = arith.addi %28, %125 : vector<8x8xi32>
    %127 = arith.cmpi sge, %29, %126 : vector<8x8xi32>
    %c4_i32_33 = arith.constant 4 : i32
    %128 = vector.broadcast %c4_i32_33 : i32 to vector<8x8xi32>
    %129 = arith.cmpi eq, %42, %128 : vector<8x8xi32>
    %130 = arith.andi %127, %129 : vector<8x8xi1>
    %131 = vector.shape_cast %117 : vector<8x1xf32> to vector<8x1xf32>
    %132 = vector.broadcast %131 : vector<8x1xf32> to vector<8x8xf32>
    %133 = arith.select %130, %132, %124 : vector<8x8xi1>, vector<8x8xf32>
    %134 = vector.extract_strided_slice %27 {offsets = [0, 5], sizes = [8, 1], strides = [1, 1]} : vector<8x8xf32> to vector<8x1xf32>
    %135 = vector.extract_strided_slice %36 {offsets = [0, 5], sizes = [8, 1], strides = [1, 1]} : vector<8x8xf32> to vector<8x1xf32>
    %136 = arith.cmpi sle, %29, %28 : vector<8x8xi32>
    %c5_i32 = arith.constant 5 : i32
    %137 = vector.broadcast %c5_i32 : i32 to vector<8x8xi32>
    %138 = arith.cmpi eq, %39, %137 : vector<8x8xi32>
    %139 = arith.andi %136, %138 : vector<8x8xi1>
    %140 = vector.shape_cast %134 : vector<8x1xf32> to vector<8x1xf32>
    %141 = vector.broadcast %140 : vector<8x1xf32> to vector<8x8xf32>
    %142 = arith.select %139, %141, %133 : vector<8x8xi1>, vector<8x8xf32>
    %c2_i32_34 = arith.constant 2 : i32
    %143 = vector.broadcast %c2_i32_34 : i32 to vector<8x8xi32>
    %144 = arith.addi %28, %143 : vector<8x8xi32>
    %145 = arith.cmpi sge, %29, %144 : vector<8x8xi32>
    %c5_i32_35 = arith.constant 5 : i32
    %146 = vector.broadcast %c5_i32_35 : i32 to vector<8x8xi32>
    %147 = arith.cmpi eq, %42, %146 : vector<8x8xi32>
    %148 = arith.andi %145, %147 : vector<8x8xi1>
    %149 = vector.shape_cast %135 : vector<8x1xf32> to vector<8x1xf32>
    %150 = vector.broadcast %149 : vector<8x1xf32> to vector<8x8xf32>
    %151 = arith.select %148, %150, %142 : vector<8x8xi1>, vector<8x8xf32>
    %152 = vector.extract_strided_slice %27 {offsets = [0, 6], sizes = [8, 1], strides = [1, 1]} : vector<8x8xf32> to vector<8x1xf32>
    %153 = vector.extract_strided_slice %36 {offsets = [0, 6], sizes = [8, 1], strides = [1, 1]} : vector<8x8xf32> to vector<8x1xf32>
    %154 = arith.cmpi sle, %29, %28 : vector<8x8xi32>
    %c6_i32 = arith.constant 6 : i32
    %155 = vector.broadcast %c6_i32 : i32 to vector<8x8xi32>
    %156 = arith.cmpi eq, %39, %155 : vector<8x8xi32>
    %157 = arith.andi %154, %156 : vector<8x8xi1>
    %158 = vector.shape_cast %152 : vector<8x1xf32> to vector<8x1xf32>
    %159 = vector.broadcast %158 : vector<8x1xf32> to vector<8x8xf32>
    %160 = arith.select %157, %159, %151 : vector<8x8xi1>, vector<8x8xf32>
    %c2_i32_36 = arith.constant 2 : i32
    %161 = vector.broadcast %c2_i32_36 : i32 to vector<8x8xi32>
    %162 = arith.addi %28, %161 : vector<8x8xi32>
    %163 = arith.cmpi sge, %29, %162 : vector<8x8xi32>
    %c6_i32_37 = arith.constant 6 : i32
    %164 = vector.broadcast %c6_i32_37 : i32 to vector<8x8xi32>
    %165 = arith.cmpi eq, %42, %164 : vector<8x8xi32>
    %166 = arith.andi %163, %165 : vector<8x8xi1>
    %167 = vector.shape_cast %153 : vector<8x1xf32> to vector<8x1xf32>
    %168 = vector.broadcast %167 : vector<8x1xf32> to vector<8x8xf32>
    %169 = arith.select %166, %168, %160 : vector<8x8xi1>, vector<8x8xf32>
    %170 = vector.extract_strided_slice %27 {offsets = [0, 7], sizes = [8, 1], strides = [1, 1]} : vector<8x8xf32> to vector<8x1xf32>
    %171 = vector.extract_strided_slice %36 {offsets = [0, 7], sizes = [8, 1], strides = [1, 1]} : vector<8x8xf32> to vector<8x1xf32>
    %172 = arith.cmpi sle, %29, %28 : vector<8x8xi32>
    %c7_i32_38 = arith.constant 7 : i32
    %173 = vector.broadcast %c7_i32_38 : i32 to vector<8x8xi32>
    %174 = arith.cmpi eq, %39, %173 : vector<8x8xi32>
    %175 = arith.andi %172, %174 : vector<8x8xi1>
    %176 = vector.shape_cast %170 : vector<8x1xf32> to vector<8x1xf32>
    %177 = vector.broadcast %176 : vector<8x1xf32> to vector<8x8xf32>
    %178 = arith.select %175, %177, %169 : vector<8x8xi1>, vector<8x8xf32>
    %c2_i32_39 = arith.constant 2 : i32
    %179 = vector.broadcast %c2_i32_39 : i32 to vector<8x8xi32>
    %180 = arith.addi %28, %179 : vector<8x8xi32>
    %181 = arith.cmpi sge, %29, %180 : vector<8x8xi32>
    %c7_i32_40 = arith.constant 7 : i32
    %182 = vector.broadcast %c7_i32_40 : i32 to vector<8x8xi32>
    %183 = arith.cmpi eq, %42, %182 : vector<8x8xi32>
    %184 = arith.andi %181, %183 : vector<8x8xi1>
    %185 = vector.shape_cast %171 : vector<8x1xf32> to vector<8x1xf32>
    %186 = vector.broadcast %185 : vector<8x1xf32> to vector<8x8xf32>
    %187 = arith.select %184, %186, %178 : vector<8x8xi1>, vector<8x8xf32>
    %188 = arith.addf %24, %187 : vector<8x8xf32>
    %cst_41 = arith.constant dense<0xFF800000> : vector<8xf32>
    %189 = vector.multi_reduction <maximumf>, %188, %cst_41 [1] : vector<8x8xf32> to vector<8xf32>
    %190 = vector.shape_cast %189 : vector<8xf32> to vector<8x1xf32>
    %191 = vector.broadcast %190 : vector<8x1xf32> to vector<8x8xf32>
    %192 = arith.subf %188, %191 : vector<8x8xf32>
    %193 = math.exp %192 : vector<8x8xf32>
    %cst_42 = arith.constant dense<0.000000e+00> : vector<8xf32>
    %194 = vector.multi_reduction <add>, %193, %cst_42 [1] : vector<8x8xf32> to vector<8xf32>
    %195 = vector.shape_cast %194 : vector<8xf32> to vector<8x1xf32>
    %196 = arith.truncf %193 : vector<8x8xf32> to vector<8x8xbf16>
    %197 = arith.truncf %8 : vector<8x16xf32> to vector<8x16xbf16>
    %cst_43 = arith.constant dense<0.000000e+00> : vector<8x16xf32>
    %198 = tpu.matmul %196, %197, %cst_43 {dimension_numbers = #tpu.dot_dimension_numbers<[1], [0], [0], [1], [0, 0, 1, 1], [], []>} : vector<8x8xbf16>, vector<8x16xbf16>, vector<8x16xf32> -> vector<8x16xf32>
    %199 = tpu.reciprocal %195 {approx = true} : vector<8x1xf32> -> vector<8x1xf32>
    %200 = vector.broadcast %199 : vector<8x1xf32> to vector<8x16xf32>
    %201 = arith.mulf %198, %200 : vector<8x16xf32>
    %202 = arith.truncf %201 : vector<8x16xf32> to vector<8x16xbf16>
    %c0_44 = arith.constant 0 : index
    %c0_45 = arith.constant 0 : index
    %c0_46 = arith.constant 0 : index
    %203 = vector.load %arg5[%c0_44, %c0_45, %c0_46] : memref<1x16x32xbf16, #tpu.memory_space<vmem>>, vector<1x16x32xbf16>
    %204 = vector.shape_cast %203 : vector<1x16x32xbf16> to vector<16x32xbf16>
    %cst_47 = arith.constant dense<0.000000e+00> : vector<8x32xf32>
    %205 = tpu.matmul %202, %204, %cst_47 {dimension_numbers = #tpu.dot_dimension_numbers<[1], [0], [0], [1], [0, 0, 1, 1], [], []>} : vector<8x16xbf16>, vector<16x32xbf16>, vector<8x32xf32> -> vector<8x32xf32>
    %c0_i32_48 = arith.constant 0 : i32
    %206 = arith.cmpi eq, %arg1, %c0_i32_48 : i32
    %207 = arith.extui %206 : i1 to i32
    %c0_i32_49 = arith.constant 0 : i32
    %208 = arith.cmpi ne, %207, %c0_i32_49 : i32
    scf.if %208 {
      %c0_54 = arith.constant 0 : index
      %c0_55 = arith.constant 0 : index
      %c0_56 = arith.constant 0 : index
      %215 = vector.load %arg10[%c0_54, %c0_55, %c0_56] : memref<1x8x32xf32, #tpu.memory_space<vmem>>, vector<1x8x32xf32>
      %216 = vector.shape_cast %215 : vector<1x8x32xf32> to vector<8x32xf32>
      %217 = vector.shape_cast %205 : vector<8x32xf32> to vector<1x8x32xf32>
      tpu.vector_store %arg10[%c0_54, %c0_55, %c0_56], %217 {strides = array<i32>} : memref<1x8x32xf32, #tpu.memory_space<vmem>>, vector<1x8x32xf32>,
    } else {
    }
    %c0_i32_50 = arith.constant 0 : i32
    %209 = arith.cmpi sgt, %arg1, %c0_i32_50 : i32
    %210 = arith.extui %209 : i1 to i32
    %c0_i32_51 = arith.constant 0 : i32
    %211 = arith.cmpi ne, %210, %c0_i32_51 : i32
    scf.if %211 {
      %c0_54 = arith.constant 0 : index
      %c0_55 = arith.constant 0 : index
      %c0_56 = arith.constant 0 : index
      %215 = vector.load %arg10[%c0_54, %c0_55, %c0_56] : memref<1x8x32xf32, #tpu.memory_space<vmem>>, vector<1x8x32xf32>
      %216 = vector.shape_cast %215 : vector<1x8x32xf32> to vector<8x32xf32>
      %217 = arith.addf %216, %205 : vector<8x32xf32>
      %c0_57 = arith.constant 0 : index
      %c0_58 = arith.constant 0 : index
      %c0_59 = arith.constant 0 : index
      %218 = vector.load %arg10[%c0_57, %c0_58, %c0_59] : memref<1x8x32xf32, #tpu.memory_space<vmem>>, vector<1x8x32xf32>
      %219 = vector.shape_cast %218 : vector<1x8x32xf32> to vector<8x32xf32>
      %220 = vector.shape_cast %217 : vector<8x32xf32> to vector<1x8x32xf32>
      tpu.vector_store %arg10[%c0_57, %c0_58, %c0_59], %220 {strides = array<i32>} : memref<1x8x32xf32, #tpu.memory_space<vmem>>, vector<1x8x32xf32>,
    } else {
    }
    %c1_i32_52 = arith.constant 1 : i32
    %212 = arith.cmpi eq, %arg1, %c1_i32_52 : i32
    %213 = arith.extui %212 : i1 to i32
    %c0_i32_53 = arith.constant 0 : i32
    %214 = arith.cmpi ne, %213, %c0_i32_53 : i32
    scf.if %214 {
      %c0_54 = arith.constant 0 : index
      %c0_55 = arith.constant 0 : index
      %c0_56 = arith.constant 0 : index
      %215 = vector.load %arg10[%c0_54, %c0_55, %c0_56] : memref<1x8x32xf32, #tpu.memory_space<vmem>>, vector<1x8x32xf32>
      %216 = vector.shape_cast %215 : vector<1x8x32xf32> to vector<8x32xf32>
      %217 = arith.addf %1, %216 : vector<8x32xf32>
      %cst_57 = arith.constant dense<0.000000e+00> : vector<8xf32>
      %218 = vector.multi_reduction <add>, %217, %cst_57 [1] : vector<8x32xf32> to vector<8xf32>
      %219 = vector.shape_cast %218 : vector<8xf32> to vector<8x1xf32>
      %cst_58 = arith.constant 3.200000e+01 : f32
      %220 = vector.broadcast %cst_58 : f32 to vector<8x1xf32>
      %221 = arith.divf %219, %220 : vector<8x1xf32>
      %222 = vector.broadcast %221 : vector<8x1xf32> to vector<8x32xf32>
      %223 = arith.subf %217, %222 : vector<8x32xf32>
      %224 = arith.mulf %223, %223 : vector<8x32xf32>
      %cst_59 = arith.constant dense<0.000000e+00> : vector<8xf32>
      %225 = vector.multi_reduction <add>, %224, %cst_59 [1] : vector<8x32xf32> to vector<8xf32>
      %226 = vector.shape_cast %225 : vector<8xf32> to vector<8x1xf32>
      %cst_60 = arith.constant 3.200000e+01 : f32
      %227 = vector.broadcast %cst_60 : f32 to vector<8x1xf32>
      %228 = arith.divf %226, %227 : vector<8x1xf32>
      %229 = vector.broadcast %221 : vector<8x1xf32> to vector<8x32xf32>
      %230 = arith.subf %217, %229 : vector<8x32xf32>
      %cst_61 = arith.constant 9.99999974E-6 : f32
      %231 = vector.broadcast %cst_61 : f32 to vector<8x1xf32>
      %232 = arith.addf %228, %231 : vector<8x1xf32>
      %233 = math.rsqrt %232 : vector<8x1xf32>
      %234 = vector.broadcast %233 : vector<8x1xf32> to vector<8x32xf32>
      %235 = arith.mulf %230, %234 : vector<8x32xf32>
      %c0_62 = arith.constant 0 : index
      %c0_63 = arith.constant 0 : index
      %236 = vector.load %arg8[%c0_62, %c0_63] : memref<1x32xf32, #tpu.memory_space<vmem>>, vector<1x32xf32>
      %237 = vector.broadcast %236 : vector<1x32xf32> to vector<8x32xf32>
      %238 = arith.mulf %235, %237 : vector<8x32xf32>
      %c0_64 = arith.constant 0 : index
      %c0_65 = arith.constant 0 : index
      %239 = vector.load %arg9[%c0_64, %c0_65] : memref<1x32xf32, #tpu.memory_space<vmem>>, vector<1x32xf32>
      %240 = vector.broadcast %239 : vector<1x32xf32> to vector<8x32xf32>
      %241 = arith.addf %238, %240 : vector<8x32xf32>
      %c0_66 = arith.constant 0 : index
      %c0_67 = arith.constant 0 : index
      %c0_68 = arith.constant 0 : index
      %242 = vector.load %arg10[%c0_66, %c0_67, %c0_68] : memref<1x8x32xf32, #tpu.memory_space<vmem>>, vector<1x8x32xf32>
      %243 = vector.shape_cast %242 : vector<1x8x32xf32> to vector<8x32xf32>
      %244 = vector.shape_cast %241 : vector<8x32xf32> to vector<1x8x32xf32>
      tpu.vector_store %arg10[%c0_66, %c0_67, %c0_68], %244 {strides = array<i32>} : memref<1x8x32xf32, #tpu.memory_space<vmem>>, vector<1x8x32xf32>,
    } else {
    }
    return
  }
  func.func @transform_0(%arg0: i32, %arg1: i32) -> (i32, i32, i32) {
    %c0_i32 = arith.constant 0 : i32
    %c0_i32_0 = arith.constant 0 : i32
    %c0_i32_1 = arith.constant 0 : i32
    return %arg0, %c0_i32, %c0_i32_0 : i32, i32, i32
  }
  func.func @transform_1(%arg0: i32, %arg1: i32) -> (i32, i32, i32) {
    %c0_i32 = arith.constant 0 : i32
    %c0_i32_0 = arith.constant 0 : i32
    %c0_i32_1 = arith.constant 0 : i32
    return %arg1, %c0_i32, %c0_i32_0 : i32, i32, i32
  }
  func.func @transform_2(%arg0: i32, %arg1: i32) -> (i32, i32, i32) {
    %c0_i32 = arith.constant 0 : i32
    %c0_i32_0 = arith.constant 0 : i32
    %c0_i32_1 = arith.constant 0 : i32
    return %arg1, %c0_i32, %c0_i32_0 : i32, i32, i32
  }
  func.func @transform_3(%arg0: i32, %arg1: i32) -> (i32, i32, i32) {
    %c0_i32 = arith.constant 0 : i32
    %c0_i32_0 = arith.constant 0 : i32
    %c0_i32_1 = arith.constant 0 : i32
    return %arg1, %c0_i32, %c0_i32_0 : i32, i32, i32
  }
  func.func @transform_4(%arg0: i32, %arg1: i32) -> (i32, i32, i32) {
    %c0_i32 = arith.constant 0 : i32
    %c0_i32_0 = arith.constant 0 : i32
    %c0_i32_1 = arith.constant 0 : i32
    return %arg1, %c0_i32, %c0_i32_0 : i32, i32, i32
  }
  func.func @transform_5(%arg0: i32, %arg1: i32) -> (i32, i32, i32) {
    %c0_i32 = arith.constant 0 : i32
    %c0_i32_0 = arith.constant 0 : i32
    %c0_i32_1 = arith.constant 0 : i32
    return %arg1, %c0_i32, %c0_i32_0 : i32, i32, i32
  }
  func.func @transform_6(%arg0: i32, %arg1: i32) -> (i32, i32) {
    %c0_i32 = arith.constant 0 : i32
    %c0_i32_0 = arith.constant 0 : i32
    %c0_i32_1 = arith.constant 0 : i32
    return %c0_i32, %c0_i32_0 : i32, i32
  }
  func.func @transform_7(%arg0: i32, %arg1: i32) -> (i32, i32) {
    %c0_i32 = arith.constant 0 : i32
    %c0_i32_0 = arith.constant 0 : i32
    %c0_i32_1 = arith.constant 0 : i32
    return %c0_i32, %c0_i32_0 : i32, i32
  }
  func.func @transform_8(%arg0: i32, %arg1: i32) -> (i32, i32, i32) {
    %c0_i32 = arith.constant 0 : i32
    %c0_i32_0 = arith.constant 0 : i32
    %c0_i32_1 = arith.constant 0 : i32
    return %arg0, %c0_i32, %c0_i32_0 : i32, i32, i32
  }
}

</mosaic_0001>

<bundles_post_ra>
// kernel: tpu_custom_call.1
= control target key start
LH: loop header
LB: loop body
LE: loop exit
PB: predicated region body
PF: predicated region fallthrough
CT: control target
= control target key end

     0   :  { %13 = vsyncpa [#allocation3], 0  ;;  %s1924_s0 = inlined_call_operand.vmem [shape: f32[2,8,32], index: 0, kind: input, shape index: {}]   ;;  %s1925_s1 = inlined_call_operand.hbm [shape: bf16[2,32,48], index: 1, kind: input, shape index: {}]   ;;  %s1926_s2 = inlined_call_operand.vmem [shape: bf16[2,16,8], index: 2, kind: input, shape index: {}]   ;;  %s1927_s3 = inlined_call_operand.vmem [shape: bf16[2,16,32], index: 3, kind: input, shape index: {}]   ;;  %s1928_s4 = inlined_call_operand.vmem [shape: f32[2,1,16], index: 4, kind: input, shape index: {}]   ;;  %s1929_s5 = inlined_call_operand.vmem [shape: f32[2,1,16], index: 5, kind: input, shape index: {}]   ;;  %s1930_s6 = inlined_call_operand.vmem [shape: f32[1,32], index: 6, kind: input, shape index: {}]   ;;  %s1931_s7 = inlined_call_operand.vmem [shape: f32[1,32], index: 7, kind: input, shape index: {}]   ;;  %s1932_s8 = inlined_call_operand.hbm [shape: f32[2,8,32], index: 8, kind: output, shape index: {}]  }
   0x1   :  { %15 = vsyncpa [#allocation3 + $0x1], 0 }
   0x2   :  { %16 = vsyncpa [#allocation4], 0 }
   0x3   :  { %18 = vsyncpa [#allocation4 + $0x1], 0  ;;  %s1566_s27 = smov 0   ;;  %s1568_s28 = smov 0  }
   0x4   :  { %s1570_s29 = smov 0   ;;  %s1572_s30 = smov 0  }
   0x5   :  { %s1574_s9 = smov 0   ;;  %s1576_s10 = smov 0  }
   0x6   :  { %s1578_s11 = smov 0   ;;  %s1580_s12 = smov 0  }
   0x7   :  { %s1582_s13 = smov 0   ;;  %s1584_s14 = smov 0  }
   0x8   :  { %s1586_s15 = smov 0  }
   0x9 LB: > { %1939 = sst [smem:[#allocation8_spill]] %s1495_s13  ;;  %s1119_s16 = sadd.s32 4294967295, %s1503_s15   ;;  %s1503_s15 = sphi %s1586_s15, %s24_s15   ;;  %s1499_s14 = sphi %s1584_s14, %s1962_s14   ;;  %s1495_s13 = sphi %s1582_s13, %s1970_s13   ;;  %s1491_s12 = sphi %s1580_s12, %s1960_s12   ;;  %s1487_s11 = sphi %s1578_s11, %s1969_s11   ;;  %s1483_s10 = sphi %s1576_s10, %s1968_s10   ;;  %s1479_s9 = sphi %s1574_s9, %s1967_s9   ;;  %s1475_s30 = sphi %s1572_s30, %s1966_s30   ;;  %s1471_s29 = sphi %s1570_s29, %s1965_s29   ;;  %s1467_s28 = sphi %s1568_s28, %s1964_s28   ;;  %s1463_s27 = sphi %s1566_s27, %s1963_s27  }
   0xa   : > { %1940 = sst [smem:[#allocation9_spill]] %s1499_s14  ;;  %s1120_s17 = sadd.s32 4294967294, %s1503_s15  }
   0xb   : > { %s33_s18 = sadd.s32 1, %s1495_s13  ;;  %s36_s19 = sadd.s32 1, %s1499_s14 }
   0xc   : > { %p34_p0 = scmp.ge.s32.totalorder %s33_s18, 2  ;;  %s69_s20 = sadd.s32 1, %s1483_s10 }
   0xd   : > { %p76_p1 = scmp.ne.s32.totalorder %s1483_s10, %s1479_s9  ;;  %p77_p2 = scmp.eq.s32.totalorder %s1503_s15, 0 }
   0xe   : > { %s1972_s18 = smov (%p34_p0, %s33_s18), 0  ;;  %s1974_s19 = smov (!%p34_p0, %s36_s19), %s1499_s14 }
   0xf   : > { %1941 = sst [smem:[#allocation10_spill]] %s1972_s18  ;;  %s66_s21 = ssub.s32 %s1495_s13, %s1972_s18 }
  0x10   : > { %p1632_p3 = por %p77_p2, %p76_p1  ;;  %p38_p4 = scmp.ge.s32.totalorder %s1974_s19, 2 }
  0x11   : > { %p67_p5 = scmp.eq.s32.totalorder %s66_s21, 0  ;;  %p82_p6 = scmp.ne.s32.totalorder %s1479_s9, %s1475_s30 }
  0x12   : > { %p83_p7 = scmp.eq.s32.totalorder %s1119_s16, 0  ;;  %s1976_s19 = smov (%p38_p4, %s1974_s19), 0 }
  0x13   : > { %1943 = sst [smem:[#allocation11_spill]] %s1976_s19  ;;  %s238_s25 = ssub.s32 %s1499_s14, %s1976_s19 }
  0x14   : > { %s1640_s23 = scalar_select %p67_p5, %s1483_s10, %s69_s20  }
  0x15   : > { %p1642_p8 = por %p83_p7, %p82_p6  ;;  %p239_p9 = scmp.eq.s32.totalorder %s238_s25, 0 }
  0x16   : > { %1944 = sst [smem:[#allocation12_spill]] %s1640_s23  ;;  %s241_s26 = sadd.s32 1, %s1471_s29 }
  0x17   : > { %p251_p10 = scmp.ne.s32.totalorder %s1471_s29, %s1467_s28  ;;  %p252_p11 = scmp.eq.s32.totalorder %s1119_s16, 3 }
  0x18   : > { %s1652_s21 = scalar_select %p239_p9, %s1471_s29, %s241_s26  }
  0x19   : > { %p1654_p12 = por %p252_p11, %p251_p10  ;;  %p257_p13 = scmp.ne.s32.totalorder %s1467_s28, %s1463_s27 }
  0x1a   : > { %1946 = sst [smem:[#allocation13_spill]] %s1652_s21  ;;  %p258_p0 = scmp.eq.s32.totalorder %s1120_s17, 3 }
  0x1b   : > { %s1947_s30 = scalar_select %p1654_p12, 1, 0 }
  0x1c   : > { %p1221_p1 = scmp.lt.s32.totalorder %s1503_s15, 4  ;;  %s291_s20 = sand.u32 1, %s1483_s10  }
  0x1d   : > { %p1662_p2 = por %p258_p0, %p257_p13  ;;  %s1123_s19 = sshll.u32 %s291_s20, 4 }
  0x1e   : > { %s1156_s25 = sshll.u32 %s1495_s13, 8  ;;  %s295_s26 = scalar_lea.vmem [#allocation2], %s1123_s19 }
  0x1f   : > { %s1948_s18 = scalar_select %p1662_p2, 1, 0 }
  0x20   : > { %s1670_s16 = scalar_lea.hbm %s1925_s1, %s1156_s25  ;;  %s302_s21 = sshll.u32 %s295_s26, 4  ;;  %s1678_s21 = int_to_ptr.vmem [resolvable:$true] %s302_s21 }
  0x21   : > { %p1674_p4 = pnand %p1221_p1, %p1632_p3  ;;  %s1680_s13 = scalar_lea.sflag [#allocation3], %s291_s20 }
  0x22   : > { %s1351_s14 = scalar_lea.hbm %s1670_s16, 256  ;;  %s1356_s23 = scalar_lea.hbm %s1925_s1, 512 }
  0x23   : > { %p1352_p5 = scmp.ne.s32.totalorder %s1670_s16, %s1351_s14  ;;  %p1353_p6 = pneg %p1674_p4 }
  0x24   : > { %p1357_p3 = scmp.lt.u32.totalorder %s1670_s16, %s1925_s1  ;;  %p1358_p10 = scmp.lt.u32.totalorder %s1356_s23, %s1351_s14 }
  0x25   : > { %p1354_p7 = pnand %p1353_p6, %p1352_p5  ;;  %p1360_p13 = scmp.lt.u32.totalorder %s1351_s14, %s1670_s16 }
  0x26   : > { %p1359_p11 = por %p1358_p10, %p1357_p3 }
  0x27   : > { %p1355_p9 = pneg %p1354_p7 }
  0x28   : > { %p1361_p0 = por %p1360_p13, %p1359_p11 }
  0x2a   : > { %p1362_p1 = pnand %p1361_p0, %p1355_p9 }
  0x2c   : > { %1365 = shalt.err (!%p1362_p1)
}
  0x2d   : > { %s1366_s20 = scalar_lea.vmem %s1678_s21, 256  ;;  %s1505_s19 = smov [#allocation2]  }
  0x2e   : > { %p1367_p5 = scmp.ne.s32.totalorder %s1678_s21, %s1366_s20  ;;  %s1371_s22 = sshll.u32 %s1505_s19, 4  ;;  %s1372_s22 = int_to_ptr.vmem [resolvable:$false] %s1371_s22 }
  0x2f   : > { %s1373_s25 = scalar_lea.vmem %s1372_s22, 512  ;;  %p1374_p12 = scmp.lt.s32.totalorder %s1678_s21, %s1372_s22 }
  0x30   : > { %p1369_p7 = pnand %p1367_p5, %p1353_p6  ;;  %p1375_p3 = scmp.lt.s32.totalorder %s1373_s25, %s1366_s20 }
  0x32   : > { %p1370_p2 = pneg %p1369_p7  ;;  %p1376_p10 = por %p1375_p3, %p1374_p12 }
  0x34   : > { %p1377_p11 = pnand %p1376_p10, %p1370_p2 }
  0x36   : > { %1380 = shalt.err (!%p1377_p11)
}
  0x37   : > { %s1506_s14 = smov 64   ;;  %s1507_s23 = smov 4  }
  0x38   : > { %1216 = dma.hbm_to_vmem [thread:$0]  (!%p1674_p4), %s1670_s16, 256, %s1678_s21, %s1680_s13, %s1506_s14, %s1506_s14, %s1507_s23  }
  0x39   : > { %p1126_p6 = scmp.ge.s32.totalorder %s1503_s15, 1  ;;  %p338_p9 = scmp.lt.s32.totalorder %s1503_s15, 5 }
  0x3b   : > { %p339_p13 = pnand %p1126_p6, %p338_p9 }
  0x3c   : > { %s344_s26 = sand.u32 (!%p339_p13), 1, %s1479_s9  }
  0x3d   : > { %342 = sbr.rel (%p339_p13) target bundleno = 1831 (0x727), region = 52  ;;  %s1127_s20 = sshll.u32 (!%p339_p13), %s344_s26, 4 }
  0x3e   : > { %s345_s19 = scalar_lea.sflag (!%p339_p13), [#allocation3], %s344_s26  ;;  %s348_s22 = scalar_lea.vmem (!%p339_p13), [#allocation2], %s1127_s20 }
  0x44   : > { %1454 = dma.done.wait (%p1642_p8), %s345_s19, 256  }
  0x45   : > { %1456 = vsyncadd (%p1642_p8), %s345_s19, 4294967040  ;;  %s1938_s13 = sand.u32 1, %s1467_s28   ;;  %p401_p12 = scmp.lt.s32.totalorder %s1491_s12, 1  ;;  %v1508_v0 = vmov 0.0   ;;  %vm1509_vm0 = vmmov 0   ;;  %v1341_v1 = vld [vmem:[%s348_s22] sm:$0xff]   ;;  %v557_v23 = vlaneseq }
  0x46   : > { %s1719_s21 = sshll.u32 %s1938_s13, 3  ;;  %1172 = vmatprep.subr.bf16.mxu0 %v1508_v0  ;;  %1176 = vmatprep.mubr.msk.bf16.mxu0 %vm1509_vm0, %v1508_v0  ;;  %v1342_v2 = vld [vmem:[%s348_s22 + $0x8] sm:$0xff]   ;;  %vm440_vm1 = vcmask 261120   ;;  %p405_p8 = scmp.lt.s32.totalorder %s1487_s11, 1  ;;  %v1510_v7 = vmov 1   ;;  %v1511_v8 = vmov 0  }
  0x47   : > { %1180 = vmatprep.subr.bf16.mxu1 %v1508_v0  ;;  %1182 = vmatprep.mubr.msk.bf16.mxu1 %vm1509_vm0, %v1508_v0  ;;  %s402_s24 = scalar_select %p401_p12, %s1491_s12, 1  ;;  %vm513_vm2 = vcmask 130048   ;;  %v1769_v24 = vshrl.u32 %v557_v23, 7  ;;  %v1771_v25 = vand.u32 127, %v557_v23  ;;  %vm564_vm4 = vcmask 64512  }
  0x48   : > { %1173 = vmatpush3.bf16.msra.mxu0 %v1341_v1  ;;  %s406_s23 = scalar_select %p405_p8, %s1487_s11, 1  ;;  %1326 = vset.pattern.permute.xlu1 %v1510_v7  ;;  %v1513_v32 = vmov 3   ;;  %v1514_v33 = vmov 2   ;;  %v1515_v34 = vmov 4   ;;  %v1516_v35 = vmov 5  }
  0x49   : > { %s1129_s16 = sshll.u32 %s402_s24, 3  ;;  %1174 = vmatprep.subr.bf16.mxu0 %v1508_v0  ;;  %1325 = vset.pattern.permute.xlu0 %v1511_v8  ;;  %v561_v26 = vadd.s32 1, %v1769_v24  ;;  %v1517_v36 = vmov 6   ;;  %v1518_v43 = vmov 7   ;;  %v638_v46 = vsub.s32 %v1769_v24, %v1771_v25  ;;  %p1147_p2 = scmp.ne.s32.totalorder %s1487_s11, 0 }
  0x4a   : > { %s404_s14 = scalar_lea.vmem %s1924_s0, %s1129_s16  ;;  %s1157_s26 = sshll.u32 %s406_s23, 3  ;;  %v640_v47 = vsub.s32 %v1771_v25, %v1769_v24  ;;  %v651_v51 = vadd.s32 2, %v1769_v24  ;;  %vm1791_vm5 = vcmp.le.s32.totalorder %v1771_v25, %v1769_v24 }
  0x4b   : > { %v1731_v3 = vld [vmem:[%s404_s14] sm:$0xff]  ;;  %s409_s22 = scalar_lea.vmem %s1926_s2, %s1157_s26  ;;  %s1748_s17 = scalar_lea.vmem %s1927_s3, %s1157_s26  ;;  %vm562_vm3 = vcmp.eq.s32.totalorder %v1771_v25, %v561_v26  ;;  %v639_v49 = vsub.s32 7, %v638_v46 }
  0x4c   : > { %v423_v4 = vpack.c.bf16 %v1731_v3, %v1731_v3  ;;  %1175 = vmatpush3.bf16.msra.mxu0 %v1342_v2  ;;  %v1343_v5 = vld [vmem:[%s409_s22] sm:$0xff]   ;;  %s420_s13 = scalar_lea.vmem %s1929_s5, %s406_s23  ;;  %s1512_s26 = smov 112   ;;  %v563_v28 = vsel %vm562_vm3, 1.0, %v1508_v0  ;;  %v1142_v50 = vadd.s32 4294967294, %v640_v47  ;;  %vm1796_vm7 = vcmp.ge.s32.totalorder %v1771_v25, %v651_v51 }
  0x4d   : > { %1191 = vmatprep.subr.bf16.mxu0 %v1508_v0  ;;  %1181 = vmatpush3.bf16.msra.mxu1 %v1343_v5  ;;  %v1138_v6 = vld [vmem:[%s420_s13] ss:$0 sm:$0xff]  ;;  %s417_s19 = scalar_lea.vmem %s1928_s4, %s406_s23  ;;  %s1519_s23 = smov 96   ;;  %vm643_vm6 = vcmp.eq.s32.totalorder %v639_v49, 0  ;;  %vm661_vm11 = vcmp.eq.s32.totalorder %v639_v49, 1  ;;  %vm675_vm15 = vcmp.eq.s32.totalorder %v639_v49, 2 }
  0x4e   : > { %1186 = vmatprep.subr.mxu1 %v1508_v0  ;;  %v1137_v17 = vld [vmem:[%s417_s19] ss:$0 sm:$0xff]  ;;  %vm653_vm8 = vcmp.eq.s32.totalorder %v1142_v50, 0  ;;  %vm644_vm9 = vmand %vm1791_vm5, %vm643_vm6  ;;  %vm668_vm12 = vcmp.eq.s32.totalorder %v1142_v50, 1  ;;  %vm689_vm3 = vcmp.eq.s32.totalorder %v639_v49, 3  ;;  %s1839_s22 = scalar_lea.vmem [#allocation5], %s1719_s21 }
  0x4f   : > { %1177 = vmatmul.mubr.msk.bf16.vlgmr.msra.gmra.mrb[0].mxu0 %vm440_vm1, %v423_v4  ;;  %vm654_vm10 = vmand %vm1796_vm7, %vm653_vm8  ;;  %vm696_vm8 = vcmp.eq.s32.totalorder %v1142_v50, 3 }
  0x50   : > { %1193 = vmatprep.mubr.msk.bf16.mxu0 %vm1509_vm0, %v1508_v0  ;;  %vm662_vm13 = vmand %vm1791_vm5, %vm661_vm11  ;;  %vm703_vm11 = vcmp.eq.s32.totalorder %v639_v49, 4 }
  0x51   : > { %vm669_vm14 = vmand %vm1796_vm7, %vm668_vm12 }
  0x52   : > { %vm676_vm6 = vmand %vm1791_vm5, %vm675_vm15 }
  0x53   : > { %vm697_vm12 = vmand %vm1796_vm7, %vm696_vm8 }
 0x122   : > { %v478_v9 = vpop.f32.mrb[0].mxu0 }
 0x123   : > { %v501_v10 = vadd.f32 %v1138_v6, %v478_v9  ;;  %v1178_v11 = vpop.f32.mrb[1].mxu0  ;;  %v1755_v12 = vpack.c.bf16 %v478_v9, %v478_v9  ;;  %v491_v18 = vadd.f32 %v1137_v17, %v478_v9 }
 0x124   : > { %v481_v13 = vpop.f32.mrb[2].mxu0 }
 0x125   : > { %v502_v14 = vmul.f32 0.25, %v501_v10  ;;  %760 = vrot.lane.b32.xlu0 %v1755_v12, %s1512_s26  ;;  %v1179_v15 = vpop.f32.mrb[3].mxu0  ;;  %v492_v21 = vmul.f32 0.25, %v491_v18 }
 0x127   : > { %v503_v16 = vpack.c.bf16 %v502_v14, %v502_v14  ;;  %v493_v22 = vpack.c.bf16 %v492_v21, %v492_v21 }
 0x129   : > { %1183 = vmatmul.mubr.msk.bf16.vlgmr.msra.gmra.mrb[0].mxu1 %vm513_vm2, %v503_v16 }
 0x12a   : > { %1188 = vmatprep.mubr.msk.f32.mxu1 %vm1509_vm0, %v1508_v0 }
 0x197   : > { %v761_v19 = vpop.permute.xlu0 %760 }
 0x198   : > { %v766_v20 = vsel %vm513_vm2, %v761_v19, 0 }
 0x199   : > { %1192 = vmatpush3.bf16.xpose.msra.mxu0 %v766_v20 }
 0x19a   : > { %1203 = vmatprep.subr.bf16.mxu0 %v1508_v0 }
 0x1a0   : > { %1194 = vmatmul.mubr.msk.bf16.vlgmr.msra.gmra.mrb[4].mxu0 %vm513_vm2, %v493_v22 }
 0x1a1   : > { %1205 = vmatprep.mubr.msk.bf16.mxu0 %vm1509_vm0, %v1508_v0 }
 0x1fc   : > { %v551_v27 = vpop.f32.mrb[0].mxu1 }
 0x1fd   : > { %664 = vperm.xlu1 %1326, %v551_v27   ;;  %647 = vperm.xlu0 %1325, %v551_v27   ;;  %v1184_v29 = vpop.f32.mrb[1].mxu1 }
 0x1fe   : > { %1187 = vmatpush3.msra.mxu1 %v551_v27  ;;  %v554_v30 = vpop.f32.mrb[2].mxu1 }
 0x1ff   : > { %1189 = vmatmul.mubr.msk.f32.vlgmr.msra.gmra.mrb[4].mxu1 %vm564_vm4, %v563_v28  ;;  %v1185_v31 = vpop.f32.mrb[3].mxu1  ;;  %1197 = vmatprep.subr.bf16.mxu1 %v1508_v0  ;;  %v1344_v30 = vld [vmem:[%s1748_s17] sm:$0xff]  }
 0x200   : > { %1199 = vmatprep.mubr.msk.bf16.mxu1 %vm1509_vm0, %v1508_v0  ;;  %vm682_vm0 = vcmp.eq.s32.totalorder %v1142_v50, 2  ;;  %1204 = vmatpush3.bf16.msra.mxu0 %v1344_v30 }
 0x201   : > { %1328 = vset.pattern.permute.xlu1 %v1513_v32  ;;  %1327 = vset.pattern.permute.xlu0 %v1514_v33 }
 0x202   : > { %692 = vperm.xlu1 %1328, %v551_v27   ;;  %678 = vperm.xlu0 %1327, %v551_v27  }
 0x206   : > { %1329 = vset.pattern.permute.xlu1 %v1515_v34  ;;  %1330 = vset.pattern.permute.xlu0 %v1516_v35 }
 0x207   : > { %706 = vperm.xlu1 %1329, %v551_v27   ;;  %720 = vperm.xlu0 %1330, %v551_v27  }
 0x20b   : > { %1331 = vset.pattern.permute.xlu1 %v1517_v36  ;;  %1335 = vset.pattern.permute.xlu0 %v1513_v32 }
 0x20c   : > { %734 = vperm.xlu1 %1331, %v551_v27  }
 0x210   : > { %1332 = vset.pattern.permute.xlu1 %v1511_v8 }
 0x273   : > { %v1780_v37 = vpop.f32.mrb[4].mxu0 }
 0x274   : > { %v1195_v38 = vpop.f32.mrb[5].mxu0 }
 0x275   : > { %v805_v39 = vpop.f32.mrb[6].mxu0 }
 0x276   : > { %v1196_v40 = vpop.f32.mrb[7].mxu0 }
 0x27c   : > { %v665_v44 = vpop.permute.xlu1 %664  ;;  %v648_v53 = vpop.permute.xlu0 %647 }
 0x27d   : > { %v650_v57 = vsel %vm644_vm9, %v648_v53, 0.0  ;;  %vm683_vm9 = vmand %vm1796_vm7, %vm682_vm0  ;;  %vm717_vm0 = vcmp.eq.s32.totalorder %v639_v49, 5 }
 0x281   : > { %v693_v45 = vpop.permute.xlu1 %692  ;;  %v679_v58 = vpop.permute.xlu0 %678 }
 0x286   : > { %v707_v48 = vpop.permute.xlu1 %706  ;;  %v721_v63 = vpop.permute.xlu0 %720 }
 0x28b   : > { %v735_v54 = vpop.permute.xlu1 %734 }
 0x2d2   : > { %v634_v41 = vpop.f32.mrb[4].mxu1 }
 0x2d3   : > { %657 = vperm.xlu1 %1332, %v634_v41   ;;  %699 = vperm.xlu0 %1335, %v634_v41   ;;  %v1190_v42 = vpop.f32.mrb[5].mxu1 }
 0x2d7   : > { %1333 = vset.pattern.permute.xlu1 %v1510_v7  ;;  %1338 = vset.pattern.permute.xlu0 %v1517_v36 }
 0x2d8   : > { %671 = vperm.xlu1 %1333, %v634_v41   ;;  %741 = vperm.xlu0 %1338, %v634_v41  }
 0x2dc   : > { %1334 = vset.pattern.permute.xlu1 %v1514_v33  ;;  %1340 = vset.pattern.permute.xlu0 %v1518_v43 }
 0x2dd   : > { %685 = vperm.xlu1 %1334, %v634_v41  }
 0x2e1   : > { %1336 = vset.pattern.permute.xlu1 %v1515_v34 }
 0x2e2   : > { %713 = vperm.xlu1 %1336, %v634_v41  }
 0x2e6   : > { %1337 = vset.pattern.permute.xlu1 %v1516_v35 }
 0x2e7   : > { %727 = vperm.xlu1 %1337, %v634_v41  }
 0x2eb   : > { %1339 = vset.pattern.permute.xlu1 %v1518_v43 }
 0x2ec   : > { %748 = vperm.xlu1 %1339, %v551_v27  }
 0x2f0   : > { %755 = vperm.xlu1 %1339, %v634_v41  }
 0x2f4   : > { %818 = vrot.lane.b32.xlu1 %v1755_v12, %s1519_s23 }
 0x352   : > { %v658_v56 = vpop.permute.xlu1 %657  ;;  %v700_v4 = vpop.permute.xlu0 %699 }
 0x353   : > { %v660_v59 = vsel %vm654_vm10, %v658_v56, %v650_v57  ;;  %vm690_vm10 = vmand %vm1791_vm5, %vm689_vm3  ;;  %vm724_vm3 = vcmp.eq.s32.totalorder %v1142_v50, 5 }
 0x354   : > { %v667_v61 = vsel %vm662_vm13, %v665_v44, %v660_v59  ;;  %vm704_vm13 = vmand %vm1791_vm5, %vm703_vm11  ;;  %vm738_vm11 = vcmp.eq.s32.totalorder %v1142_v50, 6 }
 0x355   : > { %vm725_vm8 = vmand %vm1796_vm7, %vm724_vm3  ;;  %vm823_vm3 = vcmask 1043456  }
 0x357   : > { %v672_v60 = vpop.permute.xlu1 %671  ;;  %v742_v15 = vpop.permute.xlu0 %741 }
 0x358   : > { %v674_v62 = vsel %vm669_vm14, %v672_v60, %v667_v61  ;;  %vm710_vm14 = vcmp.eq.s32.totalorder %v1142_v50, 4 }
 0x359   : > { %v681_v0 = vsel %vm676_vm6, %v679_v58, %v674_v62  ;;  %vm711_vm15 = vmand %vm1796_vm7, %vm710_vm14 }
 0x35a   : > { %vm718_vm6 = vmand %vm1791_vm5, %vm717_vm0 }
 0x35b   : > { %vm739_vm14 = vmand %vm1796_vm7, %vm738_vm11 }
 0x35c   : > { %v686_v1 = vpop.permute.xlu1 %685 }
 0x35d   : > { %v688_v2 = vsel %vm683_vm9, %v686_v1, %v681_v0  ;;  %vm731_vm9 = vcmp.eq.s32.totalorder %v639_v49, 6 }
 0x35e   : > { %v695_v5 = vsel %vm690_vm10, %v693_v45, %v688_v2  ;;  %vm732_vm10 = vmand %vm1791_vm5, %vm731_vm9 }
 0x35f   : > { %v702_v6 = vsel %vm697_vm12, %v700_v4, %v695_v5  ;;  %vm745_vm12 = vcmp.eq.s32.totalorder %v639_v49, 7 }
 0x360   : > { %v709_v7 = vsel %vm704_vm13, %v707_v48, %v702_v6  ;;  %vm752_vm13 = vcmp.eq.s32.totalorder %v1142_v50, 7 }
 0x361   : > { %v714_v8 = vpop.permute.xlu1 %713  ;;  %vm753_vm0 = vmand %vm1796_vm7, %vm752_vm13 }
 0x362   : > { %v716_v9 = vsel %vm711_vm15, %v714_v8, %v709_v7  ;;  %vm746_vm15 = vmand %vm1791_vm5, %vm745_vm12 }
 0x363   : > { %v723_v11 = vsel %vm718_vm6, %v721_v63, %v716_v9 }
 0x366   : > { %v728_v10 = vpop.permute.xlu1 %727 }
 0x367   : > { %v730_v12 = vsel %vm725_vm8, %v728_v10, %v723_v11 }
 0x368   : > { %v737_v13 = vsel %vm732_vm10, %v735_v54, %v730_v12 }
 0x369   : > { %v744_v16 = vsel %vm739_vm14, %v742_v15, %v737_v13 }
 0x36b   : > { %v749_v14 = vpop.permute.xlu1 %748 }
 0x36c   : > { %v751_v17 = vsel %vm746_vm15, %v749_v14, %v744_v16 }
 0x36f   : > { %v756_v18 = vpop.permute.xlu1 %755 }
 0x370   : > { %v758_v19 = vsel %vm753_vm0, %v756_v18, %v751_v17 }
 0x371   : > { %v803_v20 = vadd.f32 %v1780_v37, %v758_v19 }
 0x373   : > { %v819_v21 = vpop.permute.xlu1 %818  ;;  %v808_v22 = vsel %vm564_vm4, %v803_v20, -inf }
 0x374   : > { %v825_v23 = vsel %vm823_vm3, %v819_v21, 0  ;;  %809 = vmax.xlane.f32.xlu0 %v808_v22 }
 0x375   : > { %1198 = vmatpush3.bf16.msra.mxu1 %v825_v23 }
 0x401   : > { %v810_v24 = vpop.xlane.xlu0 %809 }
 0x402   : > { %v811_v25 = vsub.f32 %v803_v20, %v810_v24 }
 0x404   : > { %v812_v26 = vmul.f32 1.442695, %v811_v25 }
 0x406   : > { %1345 = vpow2.f32 %v812_v26 }
 0x410   : > { %v1346_v27 = vpop.eup %1345 }
 0x411   : > { %v814_v28 = vsel %vm564_vm4, %v1346_v27, 0.0  ;;  %v817_v29 = vpack.c.bf16 %v1346_v27, %v1346_v27 }
 0x412   : > { %815 = vadd.xlane.f32.xlu1 %v814_v28 }
 0x413   : > { %1200 = vmatmul.mubr.msk.bf16.vlgmr.msra.gmra.mrb[8].mxu1 %vm564_vm4, %v817_v29 }
 0x49f   : > { %v816_v31 = vpop.xlane.xlu1 %815 }
 0x4a0   : > { %1347 = vrcp.f32 %v816_v31 }
 0x4aa   : > { %v1348_v32 = vpop.eup %1347 }
 0x4e6   : > { %v861_v33 = vpop.f32.mrb[8].mxu1 }
 0x4e7   : > { %v868_v34 = vmul.f32 %v1348_v32, %v861_v33  ;;  %v1201_v35 = vpop.f32.mrb[9].mxu1 }
 0x4e8   : > { %v864_v36 = vpop.f32.mrb[10].mxu1 }
 0x4e9   : > { %v869_v37 = vpack.c.bf16 %v868_v34, %v868_v34  ;;  %v1202_v38 = vpop.f32.mrb[11].mxu1 }
 0x4eb   : > { %1206 = vmatmul.mubr.msk.bf16.vlgmr.msra.gmra.mrb[8].mxu0 %vm513_vm2, %v869_v37 }
 0x5bb   : > { %924 = sbr.rel (%p1147_p2) target bundleno = 1474 (0x5c2), region = 60 }
 0x5be   : > { %v915_v39 = vpop.f32.mrb[8].mxu0 }
 0x5bf   : > { %v1207_v40 = vpop.f32.mrb[9].mxu0  ;;  %925 = vst.msk [vmem:[%s1839_s22] sm:$0xff] (!%p1147_p2), %vm440_vm1, %v915_v39 }
 0x5c0   : > { %v918_v41 = vpop.f32.mrb[10].mxu0 }
 0x5c1   : > { %v1208_v42 = vpop.f32.mrb[11].mxu0 }
 0x5c2 PF: > { %p1148_p4 = scmp.le.s32.totalorder %s1487_s11, 0 }
 0x5c4   : > { %929 = sbr.rel (%p1148_p4) target bundleno = 1483 (0x5cb), region = 64 }
 0x5c6   : > { %v930_v43 = vld [vmem:[%s1839_s22] sm:$0xff] (!%p1148_p4) }
 0x5c7   : > { %v931_v44 = vadd.f32 (!%p1148_p4), %v930_v43, %v915_v39 }
 0x5c9   : > { %932 = vst.msk [vmem:[%s1839_s22] sm:$0xff] (!%p1148_p4), %vm440_vm1, %v931_v44 }
 0x5cb PF: > { %p1149_p0 = scmp.ne.s32.totalorder %s1487_s11, 1 }
 0x5cc   : > { %v1151_v58 = vld [vmem:[%s1931_s7] ss:$0 sm:$0xff] (!%p1149_p0) }
 0x5cd   : > { %936 = sbr.rel (%p1149_p0) target bundleno = 1805 (0x70d), region = 68 }
 0x5d0   : > { %v937_v45 = vld [vmem:[%s1839_s22] sm:$0xff] (!%p1149_p0) }
 0x5d1   : > { %v938_v46 = vadd.f32 (!%p1149_p0), %v937_v45, %v1731_v3  ;;  %v1150_v3 = vld [vmem:[%s1930_s6] ss:$0 sm:$0xff] (!%p1149_p0) }
 0x5d3   : > { %v939_v47 = vsel (!%p1149_p0), %vm440_vm1, %v938_v46, 0.0 }
 0x5d4   : > { %940 = vadd.xlane.f32.xlu0 %v939_v47 }
 0x661   : > { %v941_v48 = vpop.xlane.xlu0 %940 }
 0x662   : > { %v943_v49 = vmul.f32 0.03125, %v941_v48 }
 0x664   : > { %v944_v50 = vsub.f32 %v938_v46, %v943_v49 }
 0x666   : > { %v945_v51 = vmul.f32 %v944_v50, %v944_v50 }
 0x668   : > { %v946_v52 = vsel %vm440_vm1, %v945_v51, 0.0 }
 0x669   : > { %947 = vadd.xlane.f32.xlu0 %v946_v52 }
 0x6f6   : > { %v948_v53 = vpop.xlane.xlu0 %947 }
 0x6f7   : > { %v949_v54 = vmul.f32 0.03125, %v948_v53 }
 0x6f9   : > { %v950_v55 = vadd.f32 1e-05, %v949_v54 }
 0x6fb   : > { %1349 = vrsqrt.f32 %v950_v55 }
 0x705   : > { %v1350_v56 = vpop.eup %1349 }
 0x706   : > { %v952_v57 = vmul.f32 %v1350_v56, %v944_v50 }
 0x708   : > { %v960_v59 = vmul.f32 %v1150_v3, %v952_v57 }
 0x70a   : > { %v968_v60 = vadd.f32 %v1151_v58, %v960_v59 }
 0x70c   : > { %969 = vst.msk [vmem:[%s1839_s22] sm:$0xff] %vm440_vm1, %v968_v60 }
 0x70d PF: > { %s1153_s17 = sshll.u32 %s1491_s12, 7  ;;  %s984_s13 = sshll.u32 %s1839_s22, 4  ;;  %s985_s13 = int_to_ptr.vmem [resolvable:$true] %s984_s13 }
 0x70e   : > { %s1865_s26 = scalar_lea.hbm %s1932_s8, %s1153_s17  ;;  %s1954_s20 = sand.u32 1, %s1467_s28  }
 0x70f   : > { %s971_s19 = scalar_lea.sflag [#allocation4], %s1954_s20  ;;  %s1381_s23 = scalar_lea.vmem %s985_s13, 128 }
 0x710   : > { %p1382_p1 = scmp.ne.s32.totalorder %s985_s13, %s1381_s23  ;;  %p1955_p5 = scmp.ne.s32.totalorder %s1947_s30, 0 }
 0x711   : > { %s1520_s11 = smov [#allocation5]  }
 0x712   : > { %p1383_p7 = pnand %p1382_p1, %p1955_p5  ;;  %s1385_s21 = sshll.u32 %s1520_s11, 4  ;;  %s1386_s21 = int_to_ptr.vmem [resolvable:$false] %s1385_s21 }
 0x713   : > { %s1387_s24 = scalar_lea.vmem %s1386_s21, 256  ;;  %p1388_p10 = scmp.lt.s32.totalorder %s985_s13, %s1386_s21 }
 0x714   : > { %p1384_p3 = pneg %p1383_p7  ;;  %p1389_p11 = scmp.lt.s32.totalorder %s1387_s24, %s1381_s23 }
 0x716   : > { %p1390_p6 = por %p1389_p11, %p1388_p10 }
 0x718   : > { %p1391_p9 = pnand %p1390_p6, %p1384_p3 }
 0x71a   : > { %1394 = shalt.err (!%p1391_p9)
}
 0x71b   : > { %s1395_s12 = scalar_lea.hbm %s1865_s26, 128  ;;  %s1399_s17 = scalar_lea.hbm %s1932_s8, 256 }
 0x71c   : > { %p1396_p13 = scmp.ne.s32.totalorder %s1865_s26, %s1395_s12  ;;  %p1400_p2 = scmp.lt.u32.totalorder %s1865_s26, %s1932_s8 }
 0x71d   : > { %p1401_p4 = scmp.lt.u32.totalorder %s1399_s17, %s1395_s12  ;;  %p1403_p1 = scmp.lt.u32.totalorder %s1395_s12, %s1865_s26 }
 0x71e   : > { %p1397_p12 = pnand %p1396_p13, %p1955_p5 }
 0x71f   : > { %p1402_p0 = por %p1401_p4, %p1400_p2 }
 0x720   : > { %p1398_p8 = pneg %p1397_p12 }
 0x721   : > { %p1404_p7 = por %p1403_p1, %p1402_p0 }
 0x723   : > { %p1405_p3 = pnand %p1404_p7, %p1398_p8 }
 0x725   : > { %1408 = shalt.err (!%p1405_p3)
}
 0x726   : > { %1211 = dma.vmem_to_hbm [thread:$0]  (%p1955_p5), %s985_s13, 128, %s1865_s26, %s971_s19  }
 0x727 PF: > { %p1222_p10 = scmp.ge.s32.totalorder %s1503_s15, 2  ;;  %s996_s20 = sand.u32 1, %s1463_s27  }
 0x728   : > { %p1956_p11 = scmp.ne.s32.totalorder %s1948_s18, 0  ;;  %s997_s23 = scalar_lea.sflag [#allocation4], %s996_s20 }
 0x72a   : > { %p1218_p6 = pnand %p1222_p10, %p1956_p11 }
 0x72c   : > { %1458 = dma.done.wait (!%p1218_p6), %s997_s23, 128  }
 0x72d   : > { %1460 = vsyncadd (!%p1218_p6), %s997_s23, 4294967168  ;;  %s24_s15 = sadd.s32 1, %s1503_s15   ;;  %s1957_s11 = sld [smem:[#allocation13_spill]] }
 0x72e   : > { %p21_p9 = scmp.ge.s32.totalorder %s24_s15, 6   ;;  %s1958_s26 = sld [smem:[#allocation12_spill]] }
 0x72f   : > { %s1959_s13 = sld [smem:[#allocation8_spill]]  ;;  %s1960_s12 = sld [smem:[#allocation9_spill]] }
 0x730   : > { %s1961_s19 = sld [smem:[#allocation10_spill]]  ;;  %s1962_s14 = sld [smem:[#allocation11_spill]] }
 0x731   : > { %s1963_s27 = smov %s1467_s28  ;;  %s1964_s28 = smov %s1471_s29 }
 0x732   : > { %s1966_s30 = smov %s1479_s9  ;;  %s1967_s9 = smov %s1483_s10 }
 0x733   : > { %s1965_s29 = smov %s1957_s11  ;;  %23 = sbr.rel (!%p21_p9) target bundleno = 9 (0x9), region = 124 }
 0x734   : > { %s1968_s10 = smov %s1958_s26 }
 0x735   : > { %s1969_s11 = smov %s1959_s13 }
 0x736   : > { %s1970_s13 = smov %s1961_s19 }
 0x73a   :  { %1002 = vsyncpa [#allocation3], 1 }
 0x73b   :  { %1004 = vsyncpa [#allocation3 + $0x1], 1 }
 0x73c   :  { %1005 = vsyncpa [#allocation4], 1 }
 0x73d   :  { %1007 = vsyncpa [#allocation4 + $0x1], 1 }

</bundles_post_ra>
